<compile_context>
chip_gen: v5e
topology: v5e:2x2
jax: 0.10.0
libtpu: 0.0.40
codegen_flags: <defaults>
</compile_context>

<pallas_src>
import numpy as np
import jax
import jax.numpy as jnp
from jax.experimental import pallas as pl
from jax.experimental.pallas import tpu as pltpu


# ----------------------------------------------------------------------------
# In-kernel building blocks (traced inside the fused Pallas kernel)
#
# Working layout: activations are (L*bt, C) float32 with row = l*bt + b
# ("l-major").  A +/-1 shift along the sequence is then a shift by `bt` whole
# rows, so batch elements never mix and no boundary masks are needed.
# ----------------------------------------------------------------------------
def _leaky(x, slope):
    return jnp.where(x >= 0, x, jnp.float32(slope) * x)


def _shift_up(x, bt):
    # y[l*bt + b] = x[(l+1)*bt + b]   (zeros for l == L-1)
    z = jnp.zeros((bt, x.shape[1]), x.dtype)
    return jnp.concatenate([x[bt:, :], z], axis=0)


def _shift_down(x, bt):
    # y[l*bt + b] = x[(l-1)*bt + b]   (zeros for l == 0)
    z = jnp.zeros((bt, x.shape[1]), x.dtype)
    return jnp.concatenate([z, x[:-bt, :]], axis=0)


def _stack_taps(x, bt):
    # [x[l+1] | x[l] | x[l-1]] stacked along channels (lanes): (L*bt, 3*C)
    return jnp.concatenate([_shift_up(x, bt), x, _shift_down(x, bt)], axis=1)


def _convT_s1(x, w_stack, bt):
    """ConvTranspose1d(k=3, s=1, p=1) as ONE stacked matmul.

    out[l] = x[l+1] W0 + x[l] W1 + x[l-1] W2; w_stack rows = [W0; W1; W2].
    """
    return jnp.dot(_stack_taps(x, bt), w_stack,
                   preferred_element_type=jnp.float32)


def _convT_s2(x, w_fused, bt, L):
    """ConvTranspose1d(k=4, s=2, p=1), polyphase, ONE fused matmul.

    even[m] = x[m] W1 + x[m-1] W3   (output position 2m)
    odd[m]  = x[m+1] W0 + x[m] W2   (output position 2m+1)
    w_fused: (3*C_in, 2*C_out) = [[0;W1;W3] | [W0;W2;0]]  -> cols [even|odd].
    No zero-inserted tensor, no scatter matmuls: phases are interleaved with
    static row-block slices + one concatenate.  Output: (2L*bt, C_out).
    """
    c = w_fused.shape[-1] // 2
    y2 = jnp.dot(_stack_taps(x, bt), w_fused,
                 preferred_element_type=jnp.float32)        # (L*bt, 2*c)
    pieces = []
    for m in range(L):
        rows = y2[m * bt:(m + 1) * bt, :]                    # rows of step m
        pieces.append(rows[:, :c])                           # t = 2m
        pieces.append(rows[:, c:])                           # t = 2m + 1
    return jnp.concatenate(pieces, axis=0)                   # row = t*bt + b


# ----------------------------------------------------------------------------
# Fused decoder kernel (one grid step == whole decoder for one batch tile)
# ----------------------------------------------------------------------------
def _make_decoder_kernel(num_layers, bt, C0, L0, slope):
    slope = float(slope)

    def kernel(*refs):
        it = iter(refs)
        z_ref = next(it)
        lin_w_ref = next(it)
        lin_b_ref = next(it)
        blocks = [dict(w_init=next(it), w_mid=next(it), bn=next(it))
                  for _ in range(num_layers)]
        fin1_w_ref = next(it)
        fin1_bn_ref = next(it)
        fin2_w_ref = next(it)
        o_ref = next(it)

        # ---- linear: ONE (bt, Z) @ (Z, C0*L0) matmul.  Columns of lin_w /
        #      lin_b are pre-permuted so column l*C0 + c holds h[l, c].
        z = z_ref[0]                                          # (bt, Z)
        hflat = jnp.dot(z, lin_w_ref[...],
                        preferred_element_type=jnp.float32) + lin_b_ref[...]
        # retile into the l-major working layout: row = l*bt + b
        h = jnp.concatenate(
            [hflat[:, l * C0:(l + 1) * C0] for l in range(L0)], axis=0)
        L = L0

        # ---- ResBlockDeConv stack (all intermediates stay in VMEM/vregs) ----
        for blk in blocks:
            wm = blk["w_mid"][...]       # (6*c, c): rows [p1 taps; p2 taps]
            bn = blk["bn"][...]          # (6, c):  [i_s; i_sh; p1_s; p1_sh; p2_s; p2_sh]
            c = bn.shape[-1]
            y = _convT_s2(h, blk["w_init"][...], bt, L)       # (2L*bt, c)
            L = 2 * L
            y = y * bn[0:1, :] + bn[1:2, :]                   # BN (eval)
            t = _convT_s1(_leaky(y, slope), wm[:3 * c, :], bt)
            t = t * bn[2:3, :] + bn[3:4, :]
            t = _convT_s1(_leaky(t, slope), wm[3 * c:, :], bt)
            t = t * bn[4:5, :] + bn[5:6, :]
            h = _leaky(t + y, slope)                          # residual

        # ---- tail: ConvT + BN + LeakyReLU, ConvT, sigmoid ----
        fbn = fin1_bn_ref[...]                                # (2, cf)
        h = _convT_s1(h, fin1_w_ref[...], bt)
        h = _leaky(h * fbn[0:1, :] + fbn[1:2, :], slope)
        h = _convT_s1(h, fin2_w_ref[...], bt)
        h = jax.nn.sigmoid(h)                                 # (L*bt, out_ch)

        # ---- lane-dense store: (bt, L*out_ch), column = l*out_ch + c ----
        o_ref[0] = jnp.concatenate(
            [h[l * bt:(l + 1) * bt, :] for l in range(L)],
            axis=1).astype(o_ref.dtype)

    return kernel


def _pick_batch_tile(B, cap=128):
    """Largest divisor of B that is <= cap while keeping >= 2 grid steps
    (so both v7x TensorCores get a balanced 'parallel' step)."""
    if B <= 1:
        return 1
    target = min(cap, max(1, B // 2))
    for t in range(target, 0, -1):
        if B % t == 0:
            return t
    return 1


def lbae_decoder_forward(z, params, input_size, negative_slope=0.02,
                         batch_tile=None):
    C0, L0 = input_size
    num_layers = len(params["blocks"])
    out_ch = params["fin2_w"].shape[-1]
    L_final = L0 * (2 ** num_layers)
    B, Z = z.shape

    bt = batch_tile if batch_tile is not None else _pick_batch_tile(B)
    assert B % bt == 0, (B, bt)
    G = B // bt

    kernel = _make_decoder_kernel(num_layers, bt, C0, L0, negative_slope)

    def full_spec(a):
        nd = a.ndim
        return pl.BlockSpec(a.shape, lambda n, _nd=nd: (0,) * _nd)

    z3 = z.reshape(G, bt, Z).astype(jnp.float32)
    args = [z3, params["lin_w"], params["lin_b"]]
    for blk in params["blocks"]:
        args += [blk["w_init"], blk["w_mid"], blk["bn"]]
    args += [params["fin1_w"], params["fin1_bn"], params["fin2_w"]]

    in_specs = [pl.BlockSpec((1, bt, Z), lambda n: (n, 0, 0))]
    in_specs += [full_spec(a) for a in args[1:]]

    out_flat = pl.pallas_call(
        kernel,
        out_shape=jax.ShapeDtypeStruct((G, bt, L_final * out_ch), jnp.float32),
        grid=(G,),
        in_specs=in_specs,
        out_specs=pl.BlockSpec((1, bt, L_final * out_ch), lambda n: (n, 0, 0)),
        compiler_params=pltpu.CompilerParams(
            dimension_semantics=("parallel",)),    # batch tiles -> both TCs
    )(*args)
    # (G, bt, L*out_ch) -> (B, L, out_ch) -> NCL.  Tiny XLA op at the boundary.
    out = out_flat.reshape(B, L_final, out_ch)
    return jnp.transpose(out, (0, 2, 1))


# ----------------------------------------------------------------------------
# Parameters: raw (PyTorch-shaped) + one-time preprocessing into kernel layout
# ----------------------------------------------------------------------------
def init_raw_params(key, C0, L0, zsize, num_layers, out_ch):
    keys = iter(jax.random.split(key, 128))

    def nrm(shape, s=0.1):
        return (s * jax.random.normal(next(keys), shape)).astype(jnp.float32)

    def bn_params(C):
        # eval-mode BatchNorm1d folded into per-channel scale / shift
        eps = 1e-5
        gamma = 1.0 + nrm((C,))
        beta = nrm((C,))
        mean = nrm((C,))
        var = 1.0 + 0.5 * jnp.abs(jax.random.normal(next(keys), (C,)))
        scale = (gamma / jnp.sqrt(var + eps)).astype(jnp.float32)
        shift = (beta - mean * scale).astype(jnp.float32)
        return scale, shift

    D = C0 * L0
    raw = {"lin_w": nrm((zsize, D)),      # stored pre-transposed: (Z, D)
           "lin_b": nrm((D,)),
           "blocks": []}
    for i in range(num_layers):
        cin = C0 // (2 ** i)
        c = C0 // (2 ** (i + 1))
        raw["blocks"].append({
            "init_w": nrm((cin, c, 4)),   # ConvTranspose1d(cin, c, k=4, s=2, p=1)
            "init_bn": bn_params(c),
            "p1_w": nrm((c, c, 3)),       # ConvTranspose1d(c, c, k=3, s=1, p=1)
            "p1_bn": bn_params(c),
            "p2_w": nrm((c, c, 3)),
            "p2_bn": bn_params(c),
        })
    cf = C0 // (2 ** num_layers)
    raw["fin1_w"] = nrm((cf, cf, 3))
    raw["fin1_bn"] = bn_params(cf)
    raw["fin2_w"] = nrm((cf, out_ch, 3))
    return raw


def preprocess_params(raw, input_size):
    """One-time host-side weight re-layout / packing into kernel format."""
    C0, L0 = input_size
    D = C0 * L0

    def s1(w):   # (C_in, C_out, 3) -> (3*C_in, C_out), tap-major rows [W0;W1;W2]
        return jnp.transpose(w, (2, 0, 1)).reshape(-1, w.shape[1]).astype(jnp.float32)

    def s2_fused(w):  # (C_in, C_out, 4) -> (3*C_in, 2*C_out) = [[0;W1;W3]|[W0;W2;0]]
        zero = jnp.zeros_like(w[:, :, 0])
        even = jnp.concatenate([zero, w[:, :, 1], w[:, :, 3]], axis=0)
        odd = jnp.concatenate([w[:, :, 0], w[:, :, 2], zero], axis=0)
        return jnp.concatenate([even, odd], axis=1).astype(jnp.float32)

    def bn_rows(*ps):  # (scale, shift) pairs -> stacked rows (2*len(ps), C)
        rows = []
        for s, sh in ps:
            rows += [s, sh]
        return jnp.stack(rows, axis=0).astype(jnp.float32)

    # Permute linear columns so the kernel's (bt, D) matmul output is already
    # l-major: new column l*C0 + c  <-  old column c*L0 + l.
    lin_w = raw["lin_w"].reshape(-1, C0, L0).transpose(0, 2, 1).reshape(-1, D)
    lin_b = raw["lin_b"].reshape(C0, L0).T.reshape(1, D)

    params = {"lin_w": lin_w.astype(jnp.float32),
              "lin_b": lin_b.astype(jnp.float32),
              "blocks": []}
    for blk in raw["blocks"]:
        params["blocks"].append({
            "w_init": s2_fused(blk["init_w"]),                          # (3cin, 2c)
            "w_mid": jnp.concatenate([s1(blk["p1_w"]), s1(blk["p2_w"])],
                                     axis=0),                           # (6c, c)
            "bn": bn_rows(blk["init_bn"], blk["p1_bn"], blk["p2_bn"]),  # (6, c)
        })
    params["fin1_w"] = s1(raw["fin1_w"])
    params["fin1_bn"] = bn_rows(raw["fin1_bn"])                          # (2, cf)
    params["fin2_w"] = s1(raw["fin2_w"])
    return params


# ----------------------------------------------------------------------------
# Pure-JAX reference (uses the raw, PyTorch-shaped parameters)
# ----------------------------------------------------------------------------
def _ref_convT(x_nlc, w_pt, stride, padding):
    x_ncl = jnp.transpose(x_nlc, (0, 2, 1))
    K = w_pt.shape[-1]
    w_conv = jnp.transpose(jnp.flip(w_pt, -1), (1, 0, 2))   # (C_out, C_in, K)
    out = jax.lax.conv_general_dilated(
        x_ncl, w_conv, window_strides=(1,),
        padding=[(K - 1 - padding, K - 1 - padding)],
        lhs_dilation=(stride,),
        dimension_numbers=("NCH", "OIH", "NCH"))
    return jnp.transpose(out, (0, 2, 1))


def ref_forward(z, raw, input_size, negative_slope=0.02):
    C0, L0 = input_size
    B = z.shape[0]

    def lrelu(x):
        return jnp.where(x >= 0, x, negative_slope * x)

    def bn(x_nlc, p):
        return x_nlc * p[0][None, None, :] + p[1][None, None, :]

    h = z @ raw["lin_w"] + raw["lin_b"][None, :]
    h = jnp.transpose(h.reshape(B, C0, L0), (0, 2, 1))       # NLC
    for blk in raw["blocks"]:
        y = bn(_ref_convT(h, blk["init_w"], 2, 1), blk["init_bn"])
        t = bn(_ref_convT(lrelu(y), blk["p1_w"], 1, 1), blk["p1_bn"])
        t = bn(_ref_convT(lrelu(t), blk["p2_w"], 1, 1), blk["p2_bn"])
        h = lrelu(t + y)
    h = lrelu(bn(_ref_convT(h, raw["fin1_w"], 1, 1), raw["fin1_bn"]))
    h = jax.nn.sigmoid(_ref_convT(h, raw["fin2_w"], 1, 1))
    return jnp.transpose(h, (0, 2, 1))                       # NCL


# ----------------------------------------------------------------------------
if __name__ == "__main__":
    key = jax.random.PRNGKey(0)
    kz, kp = jax.random.split(key)

    # LBAEDecoder(input_size=(32, 8), output_size=(8, 32), zsize=32, num_layers=2)
    input_size = (32, 8)
    output_size = (8, 32)
    zsize = 32
    num_layers = 2
    B = 2

    raw = init_raw_params(kp, input_size[0], input_size[1], zsize, num_layers,
                          output_size[0])
    params = preprocess_params(raw, input_size)
    z = jax.random.normal(kz, (B, zsize), dtype=jnp.float32)

    expected_shape = (B, output_size[0], input_size[1] * 2 ** num_layers)
    ref = np.asarray(ref_forward(z, raw, input_size))

    # (a) default tiling: B_TILE=1, grid=(2,) -> two parallel steps (v7x TCs)
    fwd = jax.jit(lambda zz: lbae_decoder_forward(zz, params, input_size))
    out = jax.block_until_ready(fwd(z))
    assert out.shape == expected_shape, (out.shape, expected_shape)
    np.testing.assert_allclose(np.asarray(out), ref, rtol=3e-4, atol=3e-4)

    # (b) whole-batch tile: B_TILE=2, grid=(1,) -> exercises the batched path
    fwd2 = jax.jit(lambda zz: lbae_decoder_forward(zz, params, input_size,
                                                   batch_tile=B))
    out2 = jax.block_until_ready(fwd2(z))
    assert out2.shape == expected_shape, (out2.shape, expected_shape)
    np.testing.assert_allclose(np.asarray(out2), ref, rtol=3e-4, atol=3e-4)

    print("KERNEL_OK")
</pallas_src>

<mosaic_0001>
module attributes {stable_mosaic.version = 11 : i64} {
  func.func @kernel(%arg0: i32, %arg1: memref<1x1x32xf32, #tpu.memory_space<vmem>>, %arg2: memref<32x256xf32, #tpu.memory_space<vmem>>, %arg3: memref<1x256xf32, #tpu.memory_space<vmem>>, %arg4: memref<96x32xf32, #tpu.memory_space<vmem>>, %arg5: memref<96x16xf32, #tpu.memory_space<vmem>>, %arg6: memref<6x16xf32, #tpu.memory_space<vmem>>, %arg7: memref<48x16xf32, #tpu.memory_space<vmem>>, %arg8: memref<48x8xf32, #tpu.memory_space<vmem>>, %arg9: memref<6x8xf32, #tpu.memory_space<vmem>>, %arg10: memref<24x8xf32, #tpu.memory_space<vmem>>, %arg11: memref<2x8xf32, #tpu.memory_space<vmem>>, %arg12: memref<24x8xf32, #tpu.memory_space<vmem>>, %arg13: memref<1x1x256xf32, #tpu.memory_space<vmem>>) attributes {dimension_semantics = [#tpu.dimension_semantics<parallel>], iteration_bounds = array<i64: 2>, scalar_prefetch = 0 : i64, scratch_operands = 0 : i64, tpu.core_type = #tpu.core_type<tc>, window_params = [{transform_indices = @transform_0, window_bounds = array<i64: 1, 1, 32>}, {pipeline_mode = #tpu.pipeline_mode<synchronous>, transform_indices = @transform_1, window_bounds = array<i64: 32, 256>}, {pipeline_mode = #tpu.pipeline_mode<synchronous>, transform_indices = @transform_2, window_bounds = array<i64: 1, 256>}, {pipeline_mode = #tpu.pipeline_mode<synchronous>, transform_indices = @transform_3, window_bounds = array<i64: 96, 32>}, {pipeline_mode = #tpu.pipeline_mode<synchronous>, transform_indices = @transform_4, window_bounds = array<i64: 96, 16>}, {pipeline_mode = #tpu.pipeline_mode<synchronous>, transform_indices = @transform_5, window_bounds = array<i64: 6, 16>}, {pipeline_mode = #tpu.pipeline_mode<synchronous>, transform_indices = @transform_6, window_bounds = array<i64: 48, 16>}, {pipeline_mode = #tpu.pipeline_mode<synchronous>, transform_indices = @transform_7, window_bounds = array<i64: 48, 8>}, {pipeline_mode = #tpu.pipeline_mode<synchronous>, transform_indices = @transform_8, window_bounds = array<i64: 6, 8>}, {pipeline_mode = #tpu.pipeline_mode<synchronous>, transform_indices = @transform_9, window_bounds = array<i64: 24, 8>}, {pipeline_mode = #tpu.pipeline_mode<synchronous>, transform_indices = @transform_10, window_bounds = array<i64: 2, 8>}, {pipeline_mode = #tpu.pipeline_mode<synchronous>, transform_indices = @transform_11, window_bounds = array<i64: 24, 8>}, {transform_indices = @transform_12, window_bounds = array<i64: 1, 1, 256>}]} {
    %c0 = arith.constant 0 : index
    %c0_0 = arith.constant 0 : index
    %c0_1 = arith.constant 0 : index
    %0 = vector.load %arg1[%c0, %c0_0, %c0_1] : memref<1x1x32xf32, #tpu.memory_space<vmem>>, vector<1x1x32xf32>
    %1 = vector.shape_cast %0 : vector<1x1x32xf32> to vector<1x32xf32>
    %c0_2 = arith.constant 0 : index
    %c0_3 = arith.constant 0 : index
    %2 = vector.load %arg2[%c0_2, %c0_3] : memref<32x256xf32, #tpu.memory_space<vmem>>, vector<32x256xf32>
    %cst = arith.constant dense<0.000000e+00> : vector<1x256xf32>
    %3 = tpu.matmul %1, %2, %cst {dimension_numbers = #tpu.dot_dimension_numbers<[1], [0], [0], [1], [0, 0, 1, 1], [], []>} : vector<1x32xf32>, vector<32x256xf32>, vector<1x256xf32> -> vector<1x256xf32>
    %c0_4 = arith.constant 0 : index
    %c0_5 = arith.constant 0 : index
    %4 = vector.load %arg3[%c0_4, %c0_5] : memref<1x256xf32, #tpu.memory_space<vmem>>, vector<1x256xf32>
    %5 = arith.addf %3, %4 : vector<1x256xf32>
    %6 = vector.extract_strided_slice %5 {offsets = [0, 0], sizes = [1, 32], strides = [1, 1]} : vector<1x256xf32> to vector<1x32xf32>
    %7 = vector.extract_strided_slice %5 {offsets = [0, 32], sizes = [1, 32], strides = [1, 1]} : vector<1x256xf32> to vector<1x32xf32>
    %8 = vector.extract_strided_slice %5 {offsets = [0, 64], sizes = [1, 32], strides = [1, 1]} : vector<1x256xf32> to vector<1x32xf32>
    %9 = vector.extract_strided_slice %5 {offsets = [0, 96], sizes = [1, 32], strides = [1, 1]} : vector<1x256xf32> to vector<1x32xf32>
    %10 = vector.extract_strided_slice %5 {offsets = [0, 128], sizes = [1, 32], strides = [1, 1]} : vector<1x256xf32> to vector<1x32xf32>
    %11 = vector.extract_strided_slice %5 {offsets = [0, 160], sizes = [1, 32], strides = [1, 1]} : vector<1x256xf32> to vector<1x32xf32>
    %12 = vector.extract_strided_slice %5 {offsets = [0, 192], sizes = [1, 32], strides = [1, 1]} : vector<1x256xf32> to vector<1x32xf32>
    %13 = vector.extract_strided_slice %5 {offsets = [0, 224], sizes = [1, 32], strides = [1, 1]} : vector<1x256xf32> to vector<1x32xf32>
    %14 = tpu.concatenate %6, %7, %8, %9, %10, %11, %12, %13 in 0 : vector<1x32xf32>, vector<1x32xf32>, vector<1x32xf32>, vector<1x32xf32>, vector<1x32xf32>, vector<1x32xf32>, vector<1x32xf32>, vector<1x32xf32> -> vector<8x32xf32>
    %c0_6 = arith.constant 0 : index
    %c0_7 = arith.constant 0 : index
    %15 = vector.load %arg5[%c0_6, %c0_7] : memref<96x16xf32, #tpu.memory_space<vmem>>, vector<96x16xf32>
    %c0_8 = arith.constant 0 : index
    %c0_9 = arith.constant 0 : index
    %16 = vector.load %arg6[%c0_8, %c0_9] : memref<6x16xf32, #tpu.memory_space<vmem>>, vector<6x16xf32>
    %c0_10 = arith.constant 0 : index
    %c0_11 = arith.constant 0 : index
    %17 = vector.load %arg4[%c0_10, %c0_11] : memref<96x32xf32, #tpu.memory_space<vmem>>, vector<96x32xf32>
    %cst_12 = arith.constant 0.000000e+00 : f32
    %18 = vector.broadcast %cst_12 : f32 to vector<1x32xf32>
    %19 = vector.extract_strided_slice %14 {offsets = [1, 0], sizes = [7, 32], strides = [1, 1]} : vector<8x32xf32> to vector<7x32xf32>
    %20 = tpu.concatenate %19, %18 in 0 : vector<7x32xf32>, vector<1x32xf32> -> vector<8x32xf32>
    %cst_13 = arith.constant 0.000000e+00 : f32
    %21 = vector.broadcast %cst_13 : f32 to vector<1x32xf32>
    %22 = vector.extract_strided_slice %14 {offsets = [0, 0], sizes = [7, 32], strides = [1, 1]} : vector<8x32xf32> to vector<7x32xf32>
    %23 = tpu.concatenate %21, %22 in 0 : vector<1x32xf32>, vector<7x32xf32> -> vector<8x32xf32>
    %24 = tpu.concatenate %20, %14, %23 in 1 : vector<8x32xf32>, vector<8x32xf32>, vector<8x32xf32> -> vector<8x96xf32>
    %cst_14 = arith.constant dense<0.000000e+00> : vector<8x32xf32>
    %25 = tpu.matmul %24, %17, %cst_14 {dimension_numbers = #tpu.dot_dimension_numbers<[1], [0], [0], [1], [0, 0, 1, 1], [], []>} : vector<8x96xf32>, vector<96x32xf32>, vector<8x32xf32> -> vector<8x32xf32>
    %26 = vector.extract_strided_slice %25 {offsets = [0, 0], sizes = [1, 32], strides = [1, 1]} : vector<8x32xf32> to vector<1x32xf32>
    %27 = vector.extract_strided_slice %26 {offsets = [0, 0], sizes = [1, 16], strides = [1, 1]} : vector<1x32xf32> to vector<1x16xf32>
    %28 = vector.extract_strided_slice %26 {offsets = [0, 16], sizes = [1, 16], strides = [1, 1]} : vector<1x32xf32> to vector<1x16xf32>
    %29 = vector.extract_strided_slice %25 {offsets = [1, 0], sizes = [1, 32], strides = [1, 1]} : vector<8x32xf32> to vector<1x32xf32>
    %30 = vector.extract_strided_slice %29 {offsets = [0, 0], sizes = [1, 16], strides = [1, 1]} : vector<1x32xf32> to vector<1x16xf32>
    %31 = vector.extract_strided_slice %29 {offsets = [0, 16], sizes = [1, 16], strides = [1, 1]} : vector<1x32xf32> to vector<1x16xf32>
    %32 = vector.extract_strided_slice %25 {offsets = [2, 0], sizes = [1, 32], strides = [1, 1]} : vector<8x32xf32> to vector<1x32xf32>
    %33 = vector.extract_strided_slice %32 {offsets = [0, 0], sizes = [1, 16], strides = [1, 1]} : vector<1x32xf32> to vector<1x16xf32>
    %34 = vector.extract_strided_slice %32 {offsets = [0, 16], sizes = [1, 16], strides = [1, 1]} : vector<1x32xf32> to vector<1x16xf32>
    %35 = vector.extract_strided_slice %25 {offsets = [3, 0], sizes = [1, 32], strides = [1, 1]} : vector<8x32xf32> to vector<1x32xf32>
    %36 = vector.extract_strided_slice %35 {offsets = [0, 0], sizes = [1, 16], strides = [1, 1]} : vector<1x32xf32> to vector<1x16xf32>
    %37 = vector.extract_strided_slice %35 {offsets = [0, 16], sizes = [1, 16], strides = [1, 1]} : vector<1x32xf32> to vector<1x16xf32>
    %38 = vector.extract_strided_slice %25 {offsets = [4, 0], sizes = [1, 32], strides = [1, 1]} : vector<8x32xf32> to vector<1x32xf32>
    %39 = vector.extract_strided_slice %38 {offsets = [0, 0], sizes = [1, 16], strides = [1, 1]} : vector<1x32xf32> to vector<1x16xf32>
    %40 = vector.extract_strided_slice %38 {offsets = [0, 16], sizes = [1, 16], strides = [1, 1]} : vector<1x32xf32> to vector<1x16xf32>
    %41 = vector.extract_strided_slice %25 {offsets = [5, 0], sizes = [1, 32], strides = [1, 1]} : vector<8x32xf32> to vector<1x32xf32>
    %42 = vector.extract_strided_slice %41 {offsets = [0, 0], sizes = [1, 16], strides = [1, 1]} : vector<1x32xf32> to vector<1x16xf32>
    %43 = vector.extract_strided_slice %41 {offsets = [0, 16], sizes = [1, 16], strides = [1, 1]} : vector<1x32xf32> to vector<1x16xf32>
    %44 = vector.extract_strided_slice %25 {offsets = [6, 0], sizes = [1, 32], strides = [1, 1]} : vector<8x32xf32> to vector<1x32xf32>
    %45 = vector.extract_strided_slice %44 {offsets = [0, 0], sizes = [1, 16], strides = [1, 1]} : vector<1x32xf32> to vector<1x16xf32>
    %46 = vector.extract_strided_slice %44 {offsets = [0, 16], sizes = [1, 16], strides = [1, 1]} : vector<1x32xf32> to vector<1x16xf32>
    %47 = vector.extract_strided_slice %25 {offsets = [7, 0], sizes = [1, 32], strides = [1, 1]} : vector<8x32xf32> to vector<1x32xf32>
    %48 = vector.extract_strided_slice %47 {offsets = [0, 0], sizes = [1, 16], strides = [1, 1]} : vector<1x32xf32> to vector<1x16xf32>
    %49 = vector.extract_strided_slice %47 {offsets = [0, 16], sizes = [1, 16], strides = [1, 1]} : vector<1x32xf32> to vector<1x16xf32>
    %50 = tpu.concatenate %27, %28, %30, %31, %33, %34, %36, %37, %39, %40, %42, %43, %45, %46, %48, %49 in 0 : vector<1x16xf32>, vector<1x16xf32>, vector<1x16xf32>, vector<1x16xf32>, vector<1x16xf32>, vector<1x16xf32>, vector<1x16xf32>, vector<1x16xf32>, vector<1x16xf32>, vector<1x16xf32>, vector<1x16xf32>, vector<1x16xf32>, vector<1x16xf32>, vector<1x16xf32>, vector<1x16xf32>, vector<1x16xf32> -> vector<16x16xf32>
    %51 = vector.extract_strided_slice %16 {offsets = [0, 0], sizes = [1, 16], strides = [1, 1]} : vector<6x16xf32> to vector<1x16xf32>
    %52 = vector.broadcast %51 : vector<1x16xf32> to vector<16x16xf32>
    %53 = arith.mulf %50, %52 : vector<16x16xf32>
    %54 = vector.extract_strided_slice %16 {offsets = [1, 0], sizes = [1, 16], strides = [1, 1]} : vector<6x16xf32> to vector<1x16xf32>
    %55 = vector.broadcast %54 : vector<1x16xf32> to vector<16x16xf32>
    %56 = arith.addf %53, %55 : vector<16x16xf32>
    %cst_15 = arith.constant 0.000000e+00 : f32
    %57 = vector.broadcast %cst_15 : f32 to vector<16x16xf32>
    %58 = arith.cmpf oge, %56, %57 : vector<16x16xf32>
    %cst_16 = arith.constant 2.000000e-02 : f32
    %59 = vector.broadcast %cst_16 : f32 to vector<16x16xf32>
    %60 = arith.mulf %59, %56 : vector<16x16xf32>
    %61 = arith.select %58, %56, %60 : vector<16x16xi1>, vector<16x16xf32>
    %62 = vector.extract_strided_slice %15 {offsets = [0, 0], sizes = [48, 16], strides = [1, 1]} : vector<96x16xf32> to vector<48x16xf32>
    %cst_17 = arith.constant 0.000000e+00 : f32
    %63 = vector.broadcast %cst_17 : f32 to vector<1x16xf32>
    %64 = vector.extract_strided_slice %61 {offsets = [1, 0], sizes = [15, 16], strides = [1, 1]} : vector<16x16xf32> to vector<15x16xf32>
    %65 = tpu.concatenate %64, %63 in 0 : vector<15x16xf32>, vector<1x16xf32> -> vector<16x16xf32>
    %cst_18 = arith.constant 0.000000e+00 : f32
    %66 = vector.broadcast %cst_18 : f32 to vector<1x16xf32>
    %67 = vector.extract_strided_slice %61 {offsets = [0, 0], sizes = [15, 16], strides = [1, 1]} : vector<16x16xf32> to vector<15x16xf32>
    %68 = tpu.concatenate %66, %67 in 0 : vector<1x16xf32>, vector<15x16xf32> -> vector<16x16xf32>
    %69 = tpu.concatenate %65, %61, %68 in 1 : vector<16x16xf32>, vector<16x16xf32>, vector<16x16xf32> -> vector<16x48xf32>
    %cst_19 = arith.constant dense<0.000000e+00> : vector<16x16xf32>
    %70 = tpu.matmul %69, %62, %cst_19 {dimension_numbers = #tpu.dot_dimension_numbers<[1], [0], [0], [1], [0, 0, 1, 1], [], []>} : vector<16x48xf32>, vector<48x16xf32>, vector<16x16xf32> -> vector<16x16xf32>
    %71 = vector.extract_strided_slice %16 {offsets = [2, 0], sizes = [1, 16], strides = [1, 1]} : vector<6x16xf32> to vector<1x16xf32>
    %72 = vector.broadcast %71 : vector<1x16xf32> to vector<16x16xf32>
    %73 = arith.mulf %70, %72 : vector<16x16xf32>
    %74 = vector.extract_strided_slice %16 {offsets = [3, 0], sizes = [1, 16], strides = [1, 1]} : vector<6x16xf32> to vector<1x16xf32>
    %75 = vector.broadcast %74 : vector<1x16xf32> to vector<16x16xf32>
    %76 = arith.addf %73, %75 : vector<16x16xf32>
    %cst_20 = arith.constant 0.000000e+00 : f32
    %77 = vector.broadcast %cst_20 : f32 to vector<16x16xf32>
    %78 = arith.cmpf oge, %76, %77 : vector<16x16xf32>
    %cst_21 = arith.constant 2.000000e-02 : f32
    %79 = vector.broadcast %cst_21 : f32 to vector<16x16xf32>
    %80 = arith.mulf %79, %76 : vector<16x16xf32>
    %81 = arith.select %78, %76, %80 : vector<16x16xi1>, vector<16x16xf32>
    %82 = vector.extract_strided_slice %15 {offsets = [48, 0], sizes = [48, 16], strides = [1, 1]} : vector<96x16xf32> to vector<48x16xf32>
    %cst_22 = arith.constant 0.000000e+00 : f32
    %83 = vector.broadcast %cst_22 : f32 to vector<1x16xf32>
    %84 = vector.extract_strided_slice %81 {offsets = [1, 0], sizes = [15, 16], strides = [1, 1]} : vector<16x16xf32> to vector<15x16xf32>
    %85 = tpu.concatenate %84, %83 in 0 : vector<15x16xf32>, vector<1x16xf32> -> vector<16x16xf32>
    %cst_23 = arith.constant 0.000000e+00 : f32
    %86 = vector.broadcast %cst_23 : f32 to vector<1x16xf32>
    %87 = vector.extract_strided_slice %81 {offsets = [0, 0], sizes = [15, 16], strides = [1, 1]} : vector<16x16xf32> to vector<15x16xf32>
    %88 = tpu.concatenate %86, %87 in 0 : vector<1x16xf32>, vector<15x16xf32> -> vector<16x16xf32>
    %89 = tpu.concatenate %85, %81, %88 in 1 : vector<16x16xf32>, vector<16x16xf32>, vector<16x16xf32> -> vector<16x48xf32>
    %cst_24 = arith.constant dense<0.000000e+00> : vector<16x16xf32>
    %90 = tpu.matmul %89, %82, %cst_24 {dimension_numbers = #tpu.dot_dimension_numbers<[1], [0], [0], [1], [0, 0, 1, 1], [], []>} : vector<16x48xf32>, vector<48x16xf32>, vector<16x16xf32> -> vector<16x16xf32>
    %91 = vector.extract_strided_slice %16 {offsets = [4, 0], sizes = [1, 16], strides = [1, 1]} : vector<6x16xf32> to vector<1x16xf32>
    %92 = vector.broadcast %91 : vector<1x16xf32> to vector<16x16xf32>
    %93 = arith.mulf %90, %92 : vector<16x16xf32>
    %94 = vector.extract_strided_slice %16 {offsets = [5, 0], sizes = [1, 16], strides = [1, 1]} : vector<6x16xf32> to vector<1x16xf32>
    %95 = vector.broadcast %94 : vector<1x16xf32> to vector<16x16xf32>
    %96 = arith.addf %93, %95 : vector<16x16xf32>
    %97 = arith.addf %96, %56 : vector<16x16xf32>
    %cst_25 = arith.constant 0.000000e+00 : f32
    %98 = vector.broadcast %cst_25 : f32 to vector<16x16xf32>
    %99 = arith.cmpf oge, %97, %98 : vector<16x16xf32>
    %cst_26 = arith.constant 2.000000e-02 : f32
    %100 = vector.broadcast %cst_26 : f32 to vector<16x16xf32>
    %101 = arith.mulf %100, %97 : vector<16x16xf32>
    %102 = arith.select %99, %97, %101 : vector<16x16xi1>, vector<16x16xf32>
    %c0_27 = arith.constant 0 : index
    %c0_28 = arith.constant 0 : index
    %103 = vector.load %arg8[%c0_27, %c0_28] : memref<48x8xf32, #tpu.memory_space<vmem>>, vector<48x8xf32>
    %c0_29 = arith.constant 0 : index
    %c0_30 = arith.constant 0 : index
    %104 = vector.load %arg9[%c0_29, %c0_30] : memref<6x8xf32, #tpu.memory_space<vmem>>, vector<6x8xf32>
    %c0_31 = arith.constant 0 : index
    %c0_32 = arith.constant 0 : index
    %105 = vector.load %arg7[%c0_31, %c0_32] : memref<48x16xf32, #tpu.memory_space<vmem>>, vector<48x16xf32>
    %cst_33 = arith.constant 0.000000e+00 : f32
    %106 = vector.broadcast %cst_33 : f32 to vector<1x16xf32>
    %107 = vector.extract_strided_slice %102 {offsets = [1, 0], sizes = [15, 16], strides = [1, 1]} : vector<16x16xf32> to vector<15x16xf32>
    %108 = tpu.concatenate %107, %106 in 0 : vector<15x16xf32>, vector<1x16xf32> -> vector<16x16xf32>
    %cst_34 = arith.constant 0.000000e+00 : f32
    %109 = vector.broadcast %cst_34 : f32 to vector<1x16xf32>
    %110 = vector.extract_strided_slice %102 {offsets = [0, 0], sizes = [15, 16], strides = [1, 1]} : vector<16x16xf32> to vector<15x16xf32>
    %111 = tpu.concatenate %109, %110 in 0 : vector<1x16xf32>, vector<15x16xf32> -> vector<16x16xf32>
    %112 = tpu.concatenate %108, %102, %111 in 1 : vector<16x16xf32>, vector<16x16xf32>, vector<16x16xf32> -> vector<16x48xf32>
    %cst_35 = arith.constant dense<0.000000e+00> : vector<16x16xf32>
    %113 = tpu.matmul %112, %105, %cst_35 {dimension_numbers = #tpu.dot_dimension_numbers<[1], [0], [0], [1], [0, 0, 1, 1], [], []>} : vector<16x48xf32>, vector<48x16xf32>, vector<16x16xf32> -> vector<16x16xf32>
    %114 = vector.extract_strided_slice %113 {offsets = [0, 0], sizes = [1, 16], strides = [1, 1]} : vector<16x16xf32> to vector<1x16xf32>
    %115 = vector.extract_strided_slice %114 {offsets = [0, 0], sizes = [1, 8], strides = [1, 1]} : vector<1x16xf32> to vector<1x8xf32>
    %116 = vector.extract_strided_slice %114 {offsets = [0, 8], sizes = [1, 8], strides = [1, 1]} : vector<1x16xf32> to vector<1x8xf32>
    %117 = vector.extract_strided_slice %113 {offsets = [1, 0], sizes = [1, 16], strides = [1, 1]} : vector<16x16xf32> to vector<1x16xf32>
    %118 = vector.extract_strided_slice %117 {offsets = [0, 0], sizes = [1, 8], strides = [1, 1]} : vector<1x16xf32> to vector<1x8xf32>
    %119 = vector.extract_strided_slice %117 {offsets = [0, 8], sizes = [1, 8], strides = [1, 1]} : vector<1x16xf32> to vector<1x8xf32>
    %120 = vector.extract_strided_slice %113 {offsets = [2, 0], sizes = [1, 16], strides = [1, 1]} : vector<16x16xf32> to vector<1x16xf32>
    %121 = vector.extract_strided_slice %120 {offsets = [0, 0], sizes = [1, 8], strides = [1, 1]} : vector<1x16xf32> to vector<1x8xf32>
    %122 = vector.extract_strided_slice %120 {offsets = [0, 8], sizes = [1, 8], strides = [1, 1]} : vector<1x16xf32> to vector<1x8xf32>
    %123 = vector.extract_strided_slice %113 {offsets = [3, 0], sizes = [1, 16], strides = [1, 1]} : vector<16x16xf32> to vector<1x16xf32>
    %124 = vector.extract_strided_slice %123 {offsets = [0, 0], sizes = [1, 8], strides = [1, 1]} : vector<1x16xf32> to vector<1x8xf32>
    %125 = vector.extract_strided_slice %123 {offsets = [0, 8], sizes = [1, 8], strides = [1, 1]} : vector<1x16xf32> to vector<1x8xf32>
    %126 = vector.extract_strided_slice %113 {offsets = [4, 0], sizes = [1, 16], strides = [1, 1]} : vector<16x16xf32> to vector<1x16xf32>
    %127 = vector.extract_strided_slice %126 {offsets = [0, 0], sizes = [1, 8], strides = [1, 1]} : vector<1x16xf32> to vector<1x8xf32>
    %128 = vector.extract_strided_slice %126 {offsets = [0, 8], sizes = [1, 8], strides = [1, 1]} : vector<1x16xf32> to vector<1x8xf32>
    %129 = vector.extract_strided_slice %113 {offsets = [5, 0], sizes = [1, 16], strides = [1, 1]} : vector<16x16xf32> to vector<1x16xf32>
    %130 = vector.extract_strided_slice %129 {offsets = [0, 0], sizes = [1, 8], strides = [1, 1]} : vector<1x16xf32> to vector<1x8xf32>
    %131 = vector.extract_strided_slice %129 {offsets = [0, 8], sizes = [1, 8], strides = [1, 1]} : vector<1x16xf32> to vector<1x8xf32>
    %132 = vector.extract_strided_slice %113 {offsets = [6, 0], sizes = [1, 16], strides = [1, 1]} : vector<16x16xf32> to vector<1x16xf32>
    %133 = vector.extract_strided_slice %132 {offsets = [0, 0], sizes = [1, 8], strides = [1, 1]} : vector<1x16xf32> to vector<1x8xf32>
    %134 = vector.extract_strided_slice %132 {offsets = [0, 8], sizes = [1, 8], strides = [1, 1]} : vector<1x16xf32> to vector<1x8xf32>
    %135 = vector.extract_strided_slice %113 {offsets = [7, 0], sizes = [1, 16], strides = [1, 1]} : vector<16x16xf32> to vector<1x16xf32>
    %136 = vector.extract_strided_slice %135 {offsets = [0, 0], sizes = [1, 8], strides = [1, 1]} : vector<1x16xf32> to vector<1x8xf32>
    %137 = vector.extract_strided_slice %135 {offsets = [0, 8], sizes = [1, 8], strides = [1, 1]} : vector<1x16xf32> to vector<1x8xf32>
    %138 = vector.extract_strided_slice %113 {offsets = [8, 0], sizes = [1, 16], strides = [1, 1]} : vector<16x16xf32> to vector<1x16xf32>
    %139 = vector.extract_strided_slice %138 {offsets = [0, 0], sizes = [1, 8], strides = [1, 1]} : vector<1x16xf32> to vector<1x8xf32>
    %140 = vector.extract_strided_slice %138 {offsets = [0, 8], sizes = [1, 8], strides = [1, 1]} : vector<1x16xf32> to vector<1x8xf32>
    %141 = vector.extract_strided_slice %113 {offsets = [9, 0], sizes = [1, 16], strides = [1, 1]} : vector<16x16xf32> to vector<1x16xf32>
    %142 = vector.extract_strided_slice %141 {offsets = [0, 0], sizes = [1, 8], strides = [1, 1]} : vector<1x16xf32> to vector<1x8xf32>
    %143 = vector.extract_strided_slice %141 {offsets = [0, 8], sizes = [1, 8], strides = [1, 1]} : vector<1x16xf32> to vector<1x8xf32>
    %144 = vector.extract_strided_slice %113 {offsets = [10, 0], sizes = [1, 16], strides = [1, 1]} : vector<16x16xf32> to vector<1x16xf32>
    %145 = vector.extract_strided_slice %144 {offsets = [0, 0], sizes = [1, 8], strides = [1, 1]} : vector<1x16xf32> to vector<1x8xf32>
    %146 = vector.extract_strided_slice %144 {offsets = [0, 8], sizes = [1, 8], strides = [1, 1]} : vector<1x16xf32> to vector<1x8xf32>
    %147 = vector.extract_strided_slice %113 {offsets = [11, 0], sizes = [1, 16], strides = [1, 1]} : vector<16x16xf32> to vector<1x16xf32>
    %148 = vector.extract_strided_slice %147 {offsets = [0, 0], sizes = [1, 8], strides = [1, 1]} : vector<1x16xf32> to vector<1x8xf32>
    %149 = vector.extract_strided_slice %147 {offsets = [0, 8], sizes = [1, 8], strides = [1, 1]} : vector<1x16xf32> to vector<1x8xf32>
    %150 = vector.extract_strided_slice %113 {offsets = [12, 0], sizes = [1, 16], strides = [1, 1]} : vector<16x16xf32> to vector<1x16xf32>
    %151 = vector.extract_strided_slice %150 {offsets = [0, 0], sizes = [1, 8], strides = [1, 1]} : vector<1x16xf32> to vector<1x8xf32>
    %152 = vector.extract_strided_slice %150 {offsets = [0, 8], sizes = [1, 8], strides = [1, 1]} : vector<1x16xf32> to vector<1x8xf32>
    %153 = vector.extract_strided_slice %113 {offsets = [13, 0], sizes = [1, 16], strides = [1, 1]} : vector<16x16xf32> to vector<1x16xf32>
    %154 = vector.extract_strided_slice %153 {offsets = [0, 0], sizes = [1, 8], strides = [1, 1]} : vector<1x16xf32> to vector<1x8xf32>
    %155 = vector.extract_strided_slice %153 {offsets = [0, 8], sizes = [1, 8], strides = [1, 1]} : vector<1x16xf32> to vector<1x8xf32>
    %156 = vector.extract_strided_slice %113 {offsets = [14, 0], sizes = [1, 16], strides = [1, 1]} : vector<16x16xf32> to vector<1x16xf32>
    %157 = vector.extract_strided_slice %156 {offsets = [0, 0], sizes = [1, 8], strides = [1, 1]} : vector<1x16xf32> to vector<1x8xf32>
    %158 = vector.extract_strided_slice %156 {offsets = [0, 8], sizes = [1, 8], strides = [1, 1]} : vector<1x16xf32> to vector<1x8xf32>
    %159 = vector.extract_strided_slice %113 {offsets = [15, 0], sizes = [1, 16], strides = [1, 1]} : vector<16x16xf32> to vector<1x16xf32>
    %160 = vector.extract_strided_slice %159 {offsets = [0, 0], sizes = [1, 8], strides = [1, 1]} : vector<1x16xf32> to vector<1x8xf32>
    %161 = vector.extract_strided_slice %159 {offsets = [0, 8], sizes = [1, 8], strides = [1, 1]} : vector<1x16xf32> to vector<1x8xf32>
    %162 = tpu.concatenate %115, %116, %118, %119, %121, %122, %124, %125, %127, %128, %130, %131, %133, %134, %136, %137 in 0 : vector<1x8xf32>, vector<1x8xf32>, vector<1x8xf32>, vector<1x8xf32>, vector<1x8xf32>, vector<1x8xf32>, vector<1x8xf32>, vector<1x8xf32>, vector<1x8xf32>, vector<1x8xf32>, vector<1x8xf32>, vector<1x8xf32>, vector<1x8xf32>, vector<1x8xf32>, vector<1x8xf32>, vector<1x8xf32> -> vector<16x8xf32>
    %163 = tpu.concatenate %139, %140, %142, %143, %145, %146, %148, %149, %151, %152, %154, %155, %157, %158, %160, %161 in 0 : vector<1x8xf32>, vector<1x8xf32>, vector<1x8xf32>, vector<1x8xf32>, vector<1x8xf32>, vector<1x8xf32>, vector<1x8xf32>, vector<1x8xf32>, vector<1x8xf32>, vector<1x8xf32>, vector<1x8xf32>, vector<1x8xf32>, vector<1x8xf32>, vector<1x8xf32>, vector<1x8xf32>, vector<1x8xf32> -> vector<16x8xf32>
    %164 = tpu.concatenate %162, %163 in 0 : vector<16x8xf32>, vector<16x8xf32> -> vector<32x8xf32>
    %165 = vector.extract_strided_slice %104 {offsets = [0, 0], sizes = [1, 8], strides = [1, 1]} : vector<6x8xf32> to vector<1x8xf32>
    %166 = vector.broadcast %165 : vector<1x8xf32> to vector<32x8xf32>
    %167 = arith.mulf %164, %166 : vector<32x8xf32>
    %168 = vector.extract_strided_slice %104 {offsets = [1, 0], sizes = [1, 8], strides = [1, 1]} : vector<6x8xf32> to vector<1x8xf32>
    %169 = vector.broadcast %168 : vector<1x8xf32> to vector<32x8xf32>
    %170 = arith.addf %167, %169 : vector<32x8xf32>
    %cst_36 = arith.constant 0.000000e+00 : f32
    %171 = vector.broadcast %cst_36 : f32 to vector<32x8xf32>
    %172 = arith.cmpf oge, %170, %171 : vector<32x8xf32>
    %cst_37 = arith.constant 2.000000e-02 : f32
    %173 = vector.broadcast %cst_37 : f32 to vector<32x8xf32>
    %174 = arith.mulf %173, %170 : vector<32x8xf32>
    %175 = arith.select %172, %170, %174 : vector<32x8xi1>, vector<32x8xf32>
    %176 = vector.extract_strided_slice %103 {offsets = [0, 0], sizes = [24, 8], strides = [1, 1]} : vector<48x8xf32> to vector<24x8xf32>
    %cst_38 = arith.constant 0.000000e+00 : f32
    %177 = vector.broadcast %cst_38 : f32 to vector<1x8xf32>
    %178 = vector.extract_strided_slice %175 {offsets = [1, 0], sizes = [31, 8], strides = [1, 1]} : vector<32x8xf32> to vector<31x8xf32>
    %179 = tpu.concatenate %178, %177 in 0 : vector<31x8xf32>, vector<1x8xf32> -> vector<32x8xf32>
    %cst_39 = arith.constant 0.000000e+00 : f32
    %180 = vector.broadcast %cst_39 : f32 to vector<1x8xf32>
    %181 = vector.extract_strided_slice %175 {offsets = [0, 0], sizes = [31, 8], strides = [1, 1]} : vector<32x8xf32> to vector<31x8xf32>
    %182 = tpu.concatenate %180, %181 in 0 : vector<1x8xf32>, vector<31x8xf32> -> vector<32x8xf32>
    %183 = tpu.concatenate %179, %175, %182 in 1 : vector<32x8xf32>, vector<32x8xf32>, vector<32x8xf32> -> vector<32x24xf32>
    %cst_40 = arith.constant dense<0.000000e+00> : vector<32x8xf32>
    %184 = tpu.matmul %183, %176, %cst_40 {dimension_numbers = #tpu.dot_dimension_numbers<[1], [0], [0], [1], [0, 0, 1, 1], [], []>} : vector<32x24xf32>, vector<24x8xf32>, vector<32x8xf32> -> vector<32x8xf32>
    %185 = vector.extract_strided_slice %104 {offsets = [2, 0], sizes = [1, 8], strides = [1, 1]} : vector<6x8xf32> to vector<1x8xf32>
    %186 = vector.broadcast %185 : vector<1x8xf32> to vector<32x8xf32>
    %187 = arith.mulf %184, %186 : vector<32x8xf32>
    %188 = vector.extract_strided_slice %104 {offsets = [3, 0], sizes = [1, 8], strides = [1, 1]} : vector<6x8xf32> to vector<1x8xf32>
    %189 = vector.broadcast %188 : vector<1x8xf32> to vector<32x8xf32>
    %190 = arith.addf %187, %189 : vector<32x8xf32>
    %cst_41 = arith.constant 0.000000e+00 : f32
    %191 = vector.broadcast %cst_41 : f32 to vector<32x8xf32>
    %192 = arith.cmpf oge, %190, %191 : vector<32x8xf32>
    %cst_42 = arith.constant 2.000000e-02 : f32
    %193 = vector.broadcast %cst_42 : f32 to vector<32x8xf32>
    %194 = arith.mulf %193, %190 : vector<32x8xf32>
    %195 = arith.select %192, %190, %194 : vector<32x8xi1>, vector<32x8xf32>
    %196 = vector.extract_strided_slice %103 {offsets = [24, 0], sizes = [24, 8], strides = [1, 1]} : vector<48x8xf32> to vector<24x8xf32>
    %cst_43 = arith.constant 0.000000e+00 : f32
    %197 = vector.broadcast %cst_43 : f32 to vector<1x8xf32>
    %198 = vector.extract_strided_slice %195 {offsets = [1, 0], sizes = [31, 8], strides = [1, 1]} : vector<32x8xf32> to vector<31x8xf32>
    %199 = tpu.concatenate %198, %197 in 0 : vector<31x8xf32>, vector<1x8xf32> -> vector<32x8xf32>
    %cst_44 = arith.constant 0.000000e+00 : f32
    %200 = vector.broadcast %cst_44 : f32 to vector<1x8xf32>
    %201 = vector.extract_strided_slice %195 {offsets = [0, 0], sizes = [31, 8], strides = [1, 1]} : vector<32x8xf32> to vector<31x8xf32>
    %202 = tpu.concatenate %200, %201 in 0 : vector<1x8xf32>, vector<31x8xf32> -> vector<32x8xf32>
    %203 = tpu.concatenate %199, %195, %202 in 1 : vector<32x8xf32>, vector<32x8xf32>, vector<32x8xf32> -> vector<32x24xf32>
    %cst_45 = arith.constant dense<0.000000e+00> : vector<32x8xf32>
    %204 = tpu.matmul %203, %196, %cst_45 {dimension_numbers = #tpu.dot_dimension_numbers<[1], [0], [0], [1], [0, 0, 1, 1], [], []>} : vector<32x24xf32>, vector<24x8xf32>, vector<32x8xf32> -> vector<32x8xf32>
    %205 = vector.extract_strided_slice %104 {offsets = [4, 0], sizes = [1, 8], strides = [1, 1]} : vector<6x8xf32> to vector<1x8xf32>
    %206 = vector.broadcast %205 : vector<1x8xf32> to vector<32x8xf32>
    %207 = arith.mulf %204, %206 : vector<32x8xf32>
    %208 = vector.extract_strided_slice %104 {offsets = [5, 0], sizes = [1, 8], strides = [1, 1]} : vector<6x8xf32> to vector<1x8xf32>
    %209 = vector.broadcast %208 : vector<1x8xf32> to vector<32x8xf32>
    %210 = arith.addf %207, %209 : vector<32x8xf32>
    %211 = arith.addf %210, %170 : vector<32x8xf32>
    %cst_46 = arith.constant 0.000000e+00 : f32
    %212 = vector.broadcast %cst_46 : f32 to vector<32x8xf32>
    %213 = arith.cmpf oge, %211, %212 : vector<32x8xf32>
    %cst_47 = arith.constant 2.000000e-02 : f32
    %214 = vector.broadcast %cst_47 : f32 to vector<32x8xf32>
    %215 = arith.mulf %214, %211 : vector<32x8xf32>
    %216 = arith.select %213, %211, %215 : vector<32x8xi1>, vector<32x8xf32>
    %c0_48 = arith.constant 0 : index
    %c0_49 = arith.constant 0 : index
    %217 = vector.load %arg11[%c0_48, %c0_49] : memref<2x8xf32, #tpu.memory_space<vmem>>, vector<2x8xf32>
    %c0_50 = arith.constant 0 : index
    %c0_51 = arith.constant 0 : index
    %218 = vector.load %arg10[%c0_50, %c0_51] : memref<24x8xf32, #tpu.memory_space<vmem>>, vector<24x8xf32>
    %cst_52 = arith.constant 0.000000e+00 : f32
    %219 = vector.broadcast %cst_52 : f32 to vector<1x8xf32>
    %220 = vector.extract_strided_slice %216 {offsets = [1, 0], sizes = [31, 8], strides = [1, 1]} : vector<32x8xf32> to vector<31x8xf32>
    %221 = tpu.concatenate %220, %219 in 0 : vector<31x8xf32>, vector<1x8xf32> -> vector<32x8xf32>
    %cst_53 = arith.constant 0.000000e+00 : f32
    %222 = vector.broadcast %cst_53 : f32 to vector<1x8xf32>
    %223 = vector.extract_strided_slice %216 {offsets = [0, 0], sizes = [31, 8], strides = [1, 1]} : vector<32x8xf32> to vector<31x8xf32>
    %224 = tpu.concatenate %222, %223 in 0 : vector<1x8xf32>, vector<31x8xf32> -> vector<32x8xf32>
    %225 = tpu.concatenate %221, %216, %224 in 1 : vector<32x8xf32>, vector<32x8xf32>, vector<32x8xf32> -> vector<32x24xf32>
    %cst_54 = arith.constant dense<0.000000e+00> : vector<32x8xf32>
    %226 = tpu.matmul %225, %218, %cst_54 {dimension_numbers = #tpu.dot_dimension_numbers<[1], [0], [0], [1], [0, 0, 1, 1], [], []>} : vector<32x24xf32>, vector<24x8xf32>, vector<32x8xf32> -> vector<32x8xf32>
    %227 = vector.extract_strided_slice %217 {offsets = [0, 0], sizes = [1, 8], strides = [1, 1]} : vector<2x8xf32> to vector<1x8xf32>
    %228 = vector.broadcast %227 : vector<1x8xf32> to vector<32x8xf32>
    %229 = arith.mulf %226, %228 : vector<32x8xf32>
    %230 = vector.extract_strided_slice %217 {offsets = [1, 0], sizes = [1, 8], strides = [1, 1]} : vector<2x8xf32> to vector<1x8xf32>
    %231 = vector.broadcast %230 : vector<1x8xf32> to vector<32x8xf32>
    %232 = arith.addf %229, %231 : vector<32x8xf32>
    %cst_55 = arith.constant 0.000000e+00 : f32
    %233 = vector.broadcast %cst_55 : f32 to vector<32x8xf32>
    %234 = arith.cmpf oge, %232, %233 : vector<32x8xf32>
    %cst_56 = arith.constant 2.000000e-02 : f32
    %235 = vector.broadcast %cst_56 : f32 to vector<32x8xf32>
    %236 = arith.mulf %235, %232 : vector<32x8xf32>
    %237 = arith.select %234, %232, %236 : vector<32x8xi1>, vector<32x8xf32>
    %c0_57 = arith.constant 0 : index
    %c0_58 = arith.constant 0 : index
    %238 = vector.load %arg12[%c0_57, %c0_58] : memref<24x8xf32, #tpu.memory_space<vmem>>, vector<24x8xf32>
    %cst_59 = arith.constant 0.000000e+00 : f32
    %239 = vector.broadcast %cst_59 : f32 to vector<1x8xf32>
    %240 = vector.extract_strided_slice %237 {offsets = [1, 0], sizes = [31, 8], strides = [1, 1]} : vector<32x8xf32> to vector<31x8xf32>
    %241 = tpu.concatenate %240, %239 in 0 : vector<31x8xf32>, vector<1x8xf32> -> vector<32x8xf32>
    %cst_60 = arith.constant 0.000000e+00 : f32
    %242 = vector.broadcast %cst_60 : f32 to vector<1x8xf32>
    %243 = vector.extract_strided_slice %237 {offsets = [0, 0], sizes = [31, 8], strides = [1, 1]} : vector<32x8xf32> to vector<31x8xf32>
    %244 = tpu.concatenate %242, %243 in 0 : vector<1x8xf32>, vector<31x8xf32> -> vector<32x8xf32>
    %245 = tpu.concatenate %241, %237, %244 in 1 : vector<32x8xf32>, vector<32x8xf32>, vector<32x8xf32> -> vector<32x24xf32>
    %cst_61 = arith.constant dense<0.000000e+00> : vector<32x8xf32>
    %246 = tpu.matmul %245, %238, %cst_61 {dimension_numbers = #tpu.dot_dimension_numbers<[1], [0], [0], [1], [0, 0, 1, 1], [], []>} : vector<32x24xf32>, vector<24x8xf32>, vector<32x8xf32> -> vector<32x8xf32>
    %247 = arith.negf %246 : vector<32x8xf32>
    %248 = math.exp %247 : vector<32x8xf32>
    %cst_62 = arith.constant 1.000000e+00 : f32
    %249 = vector.broadcast %cst_62 : f32 to vector<32x8xf32>
    %250 = arith.addf %249, %248 : vector<32x8xf32>
    %251 = arith.divf %249, %250 : vector<32x8xf32>
    %252 = vector.extract_strided_slice %251 {offsets = [0, 0], sizes = [1, 8], strides = [1, 1]} : vector<32x8xf32> to vector<1x8xf32>
    %253 = vector.extract_strided_slice %251 {offsets = [1, 0], sizes = [1, 8], strides = [1, 1]} : vector<32x8xf32> to vector<1x8xf32>
    %254 = vector.extract_strided_slice %251 {offsets = [2, 0], sizes = [1, 8], strides = [1, 1]} : vector<32x8xf32> to vector<1x8xf32>
    %255 = vector.extract_strided_slice %251 {offsets = [3, 0], sizes = [1, 8], strides = [1, 1]} : vector<32x8xf32> to vector<1x8xf32>
    %256 = vector.extract_strided_slice %251 {offsets = [4, 0], sizes = [1, 8], strides = [1, 1]} : vector<32x8xf32> to vector<1x8xf32>
    %257 = vector.extract_strided_slice %251 {offsets = [5, 0], sizes = [1, 8], strides = [1, 1]} : vector<32x8xf32> to vector<1x8xf32>
    %258 = vector.extract_strided_slice %251 {offsets = [6, 0], sizes = [1, 8], strides = [1, 1]} : vector<32x8xf32> to vector<1x8xf32>
    %259 = vector.extract_strided_slice %251 {offsets = [7, 0], sizes = [1, 8], strides = [1, 1]} : vector<32x8xf32> to vector<1x8xf32>
    %260 = vector.extract_strided_slice %251 {offsets = [8, 0], sizes = [1, 8], strides = [1, 1]} : vector<32x8xf32> to vector<1x8xf32>
    %261 = vector.extract_strided_slice %251 {offsets = [9, 0], sizes = [1, 8], strides = [1, 1]} : vector<32x8xf32> to vector<1x8xf32>
    %262 = vector.extract_strided_slice %251 {offsets = [10, 0], sizes = [1, 8], strides = [1, 1]} : vector<32x8xf32> to vector<1x8xf32>
    %263 = vector.extract_strided_slice %251 {offsets = [11, 0], sizes = [1, 8], strides = [1, 1]} : vector<32x8xf32> to vector<1x8xf32>
    %264 = vector.extract_strided_slice %251 {offsets = [12, 0], sizes = [1, 8], strides = [1, 1]} : vector<32x8xf32> to vector<1x8xf32>
    %265 = vector.extract_strided_slice %251 {offsets = [13, 0], sizes = [1, 8], strides = [1, 1]} : vector<32x8xf32> to vector<1x8xf32>
    %266 = vector.extract_strided_slice %251 {offsets = [14, 0], sizes = [1, 8], strides = [1, 1]} : vector<32x8xf32> to vector<1x8xf32>
    %267 = vector.extract_strided_slice %251 {offsets = [15, 0], sizes = [1, 8], strides = [1, 1]} : vector<32x8xf32> to vector<1x8xf32>
    %268 = vector.extract_strided_slice %251 {offsets = [16, 0], sizes = [1, 8], strides = [1, 1]} : vector<32x8xf32> to vector<1x8xf32>
    %269 = vector.extract_strided_slice %251 {offsets = [17, 0], sizes = [1, 8], strides = [1, 1]} : vector<32x8xf32> to vector<1x8xf32>
    %270 = vector.extract_strided_slice %251 {offsets = [18, 0], sizes = [1, 8], strides = [1, 1]} : vector<32x8xf32> to vector<1x8xf32>
    %271 = vector.extract_strided_slice %251 {offsets = [19, 0], sizes = [1, 8], strides = [1, 1]} : vector<32x8xf32> to vector<1x8xf32>
    %272 = vector.extract_strided_slice %251 {offsets = [20, 0], sizes = [1, 8], strides = [1, 1]} : vector<32x8xf32> to vector<1x8xf32>
    %273 = vector.extract_strided_slice %251 {offsets = [21, 0], sizes = [1, 8], strides = [1, 1]} : vector<32x8xf32> to vector<1x8xf32>
    %274 = vector.extract_strided_slice %251 {offsets = [22, 0], sizes = [1, 8], strides = [1, 1]} : vector<32x8xf32> to vector<1x8xf32>
    %275 = vector.extract_strided_slice %251 {offsets = [23, 0], sizes = [1, 8], strides = [1, 1]} : vector<32x8xf32> to vector<1x8xf32>
    %276 = vector.extract_strided_slice %251 {offsets = [24, 0], sizes = [1, 8], strides = [1, 1]} : vector<32x8xf32> to vector<1x8xf32>
    %277 = vector.extract_strided_slice %251 {offsets = [25, 0], sizes = [1, 8], strides = [1, 1]} : vector<32x8xf32> to vector<1x8xf32>
    %278 = vector.extract_strided_slice %251 {offsets = [26, 0], sizes = [1, 8], strides = [1, 1]} : vector<32x8xf32> to vector<1x8xf32>
    %279 = vector.extract_strided_slice %251 {offsets = [27, 0], sizes = [1, 8], strides = [1, 1]} : vector<32x8xf32> to vector<1x8xf32>
    %280 = vector.extract_strided_slice %251 {offsets = [28, 0], sizes = [1, 8], strides = [1, 1]} : vector<32x8xf32> to vector<1x8xf32>
    %281 = vector.extract_strided_slice %251 {offsets = [29, 0], sizes = [1, 8], strides = [1, 1]} : vector<32x8xf32> to vector<1x8xf32>
    %282 = vector.extract_strided_slice %251 {offsets = [30, 0], sizes = [1, 8], strides = [1, 1]} : vector<32x8xf32> to vector<1x8xf32>
    %283 = vector.extract_strided_slice %251 {offsets = [31, 0], sizes = [1, 8], strides = [1, 1]} : vector<32x8xf32> to vector<1x8xf32>
    %284 = tpu.concatenate %252, %253, %254, %255, %256, %257, %258, %259, %260, %261, %262, %263, %264, %265, %266, %267 in 1 : vector<1x8xf32>, vector<1x8xf32>, vector<1x8xf32>, vector<1x8xf32>, vector<1x8xf32>, vector<1x8xf32>, vector<1x8xf32>, vector<1x8xf32>, vector<1x8xf32>, vector<1x8xf32>, vector<1x8xf32>, vector<1x8xf32>, vector<1x8xf32>, vector<1x8xf32>, vector<1x8xf32>, vector<1x8xf32> -> vector<1x128xf32>
    %285 = tpu.concatenate %268, %269, %270, %271, %272, %273, %274, %275, %276, %277, %278, %279, %280, %281, %282, %283 in 1 : vector<1x8xf32>, vector<1x8xf32>, vector<1x8xf32>, vector<1x8xf32>, vector<1x8xf32>, vector<1x8xf32>, vector<1x8xf32>, vector<1x8xf32>, vector<1x8xf32>, vector<1x8xf32>, vector<1x8xf32>, vector<1x8xf32>, vector<1x8xf32>, vector<1x8xf32>, vector<1x8xf32>, vector<1x8xf32> -> vector<1x128xf32>
    %286 = tpu.concatenate %284, %285 in 1 : vector<1x128xf32>, vector<1x128xf32> -> vector<1x256xf32>
    %c0_63 = arith.constant 0 : index
    %c0_64 = arith.constant 0 : index
    %c0_65 = arith.constant 0 : index
    %287 = vector.load %arg13[%c0_63, %c0_64, %c0_65] : memref<1x1x256xf32, #tpu.memory_space<vmem>>, vector<1x1x256xf32>
    %288 = vector.shape_cast %287 : vector<1x1x256xf32> to vector<1x256xf32>
    %289 = vector.shape_cast %286 : vector<1x256xf32> to vector<1x1x256xf32>
    tpu.vector_store %arg13[%c0_63, %c0_64, %c0_65], %289 {strides = array<i32>} : memref<1x1x256xf32, #tpu.memory_space<vmem>>, vector<1x1x256xf32>,
    return
  }
  func.func @transform_0(%arg0: i32) -> (i32, i32, i32) {
    %c0_i32 = arith.constant 0 : i32
    %c0_i32_0 = arith.constant 0 : i32
    %c0_i32_1 = arith.constant 0 : i32
    return %arg0, %c0_i32, %c0_i32_0 : i32, i32, i32
  }
  func.func @transform_1(%arg0: i32) -> (i32, i32) {
    %c0_i32 = arith.constant 0 : i32
    %c0_i32_0 = arith.constant 0 : i32
    %c0_i32_1 = arith.constant 0 : i32
    return %c0_i32, %c0_i32_0 : i32, i32
  }
  func.func @transform_2(%arg0: i32) -> (i32, i32) {
    %c0_i32 = arith.constant 0 : i32
    %c0_i32_0 = arith.constant 0 : i32
    %c0_i32_1 = arith.constant 0 : i32
    return %c0_i32, %c0_i32_0 : i32, i32
  }
  func.func @transform_3(%arg0: i32) -> (i32, i32) {
    %c0_i32 = arith.constant 0 : i32
    %c0_i32_0 = arith.constant 0 : i32
    %c0_i32_1 = arith.constant 0 : i32
    return %c0_i32, %c0_i32_0 : i32, i32
  }
  func.func @transform_4(%arg0: i32) -> (i32, i32) {
    %c0_i32 = arith.constant 0 : i32
    %c0_i32_0 = arith.constant 0 : i32
    %c0_i32_1 = arith.constant 0 : i32
    return %c0_i32, %c0_i32_0 : i32, i32
  }
  func.func @transform_5(%arg0: i32) -> (i32, i32) {
    %c0_i32 = arith.constant 0 : i32
    %c0_i32_0 = arith.constant 0 : i32
    %c0_i32_1 = arith.constant 0 : i32
    return %c0_i32, %c0_i32_0 : i32, i32
  }
  func.func @transform_6(%arg0: i32) -> (i32, i32) {
    %c0_i32 = arith.constant 0 : i32
    %c0_i32_0 = arith.constant 0 : i32
    %c0_i32_1 = arith.constant 0 : i32
    return %c0_i32, %c0_i32_0 : i32, i32
  }
  func.func @transform_7(%arg0: i32) -> (i32, i32) {
    %c0_i32 = arith.constant 0 : i32
    %c0_i32_0 = arith.constant 0 : i32
    %c0_i32_1 = arith.constant 0 : i32
    return %c0_i32, %c0_i32_0 : i32, i32
  }
  func.func @transform_8(%arg0: i32) -> (i32, i32) {
    %c0_i32 = arith.constant 0 : i32
    %c0_i32_0 = arith.constant 0 : i32
    %c0_i32_1 = arith.constant 0 : i32
    return %c0_i32, %c0_i32_0 : i32, i32
  }
  func.func @transform_9(%arg0: i32) -> (i32, i32) {
    %c0_i32 = arith.constant 0 : i32
    %c0_i32_0 = arith.constant 0 : i32
    %c0_i32_1 = arith.constant 0 : i32
    return %c0_i32, %c0_i32_0 : i32, i32
  }
  func.func @transform_10(%arg0: i32) -> (i32, i32) {
    %c0_i32 = arith.constant 0 : i32
    %c0_i32_0 = arith.constant 0 : i32
    %c0_i32_1 = arith.constant 0 : i32
    return %c0_i32, %c0_i32_0 : i32, i32
  }
  func.func @transform_11(%arg0: i32) -> (i32, i32) {
    %c0_i32 = arith.constant 0 : i32
    %c0_i32_0 = arith.constant 0 : i32
    %c0_i32_1 = arith.constant 0 : i32
    return %c0_i32, %c0_i32_0 : i32, i32
  }
  func.func @transform_12(%arg0: i32) -> (i32, i32, i32) {
    %c0_i32 = arith.constant 0 : i32
    %c0_i32_0 = arith.constant 0 : i32
    %c0_i32_1 = arith.constant 0 : i32
    return %arg0, %c0_i32, %c0_i32_0 : i32, i32, i32
  }
}

</mosaic_0001>

<bundles_post_ra>
// kernel: _lambda_.1
= control target key start
LH: loop header
LB: loop body
LE: loop exit
PB: predicated region body
PF: predicated region fallthrough
CT: control target
= control target key end

     0   :  { %s3301_s0 = inlined_call_operand.hbm [shape: f32[2,1,32], index: 0, kind: input, shape index: {}]   ;;  %s3302_s1 = inlined_call_operand.hbm [shape: f32[32,256], index: 1, kind: input, shape index: {}]   ;;  %s3303_s2 = inlined_call_operand.hbm [shape: f32[1,256], index: 2, kind: input, shape index: {}]   ;;  %s3304_s3 = inlined_call_operand.hbm [shape: f32[96,32], index: 3, kind: input, shape index: {}]   ;;  %s3305_s4 = inlined_call_operand.hbm [shape: f32[96,16], index: 4, kind: input, shape index: {}]   ;;  %s3306_s5 = inlined_call_operand.hbm [shape: f32[6,16], index: 5, kind: input, shape index: {}]   ;;  %s3307_s6 = inlined_call_operand.hbm [shape: f32[48,16], index: 6, kind: input, shape index: {}]   ;;  %s3308_s7 = inlined_call_operand.hbm [shape: f32[48,8], index: 7, kind: input, shape index: {}]   ;;  %s3309_s8 = inlined_call_operand.vmem [shape: f32[6,8], index: 8, kind: input, shape index: {}]   ;;  %s3310_s9 = inlined_call_operand.hbm [shape: f32[24,8], index: 9, kind: input, shape index: {}]   ;;  %s3311_s10 = inlined_call_operand.vmem [shape: f32[2,8], index: 10, kind: input, shape index: {}]   ;;  %s3312_s11 = inlined_call_operand.hbm [shape: f32[24,8], index: 11, kind: input, shape index: {}]   ;;  %s3313_s12 = inlined_call_operand.vmem [shape: f32[2,1,256], index: 12, kind: output, shape index: {}]  }
   0x1   :  { %3314 = sst [smem:[#allocation24_spill]] %s3302_s1 }
   0x2   :  { %3315 = sst [smem:[#allocation25_spill]] %s3304_s3 }
   0x3   :  { %3316 = sst [smem:[#allocation26_spill]] %s3311_s10 }
   0x4   :  { %3317 = sst [smem:[#allocation27_spill]] %s3313_s12 }
   0x5   :  { %17 = vsyncpa [#allocation3], 0 }
   0x6   :  { %19 = vsyncpa [#allocation3 + $0x1], 0 }
   0x7   :  { %20 = vsyncpa [#allocation5], 0 }
   0x8   :  { %21 = vsyncpa [#allocation8], 0 }
   0x9   :  { %22 = vsyncpa [#allocation11], 0 }
   0xa   :  { %23 = vsyncpa [#allocation14], 0 }
   0xb   :  { %24 = vsyncpa [#allocation17], 0  ;;  %s2686_s21 = smov 0   ;;  %s2688_s22 = smov 0  }
   0xc   :  { %s2690_s23 = smov 0   ;;  %s2692_s24 = smov 0  }
   0xd LB: > { %s3318_s1 = sld [smem:[#allocation24_spill]]  ;;  %s2710_s28 = sadd.s32 4294967295, %s2591_s24   ;;  %s2591_s24 = sphi %s2692_s24, %s3329_s24   ;;  %s2587_s23 = sphi %s2690_s23, %s3328_s23   ;;  %s2583_s22 = sphi %s2688_s22, %s3327_s22   ;;  %s2579_s21 = sphi %s2686_s21, %s3326_s21  }
   0xe   : > { %p2019_p0 = scmp.ge.s32.totalorder %s2591_s24, 1  ;;  %p51_p1 = scmp.eq.s32.totalorder %s2710_s28, 0 }
   0xf   : > { %p318_p2 = scmp.lt.s32.totalorder %s2591_s24, 3  ;;  %s2593_s30 = smov [#allocation4]  }
  0x10   : > { %s331_s13 = sshll.u32 %s2593_s30, 4  ;;  %s3320_s3 = sld [smem:[#allocation25_spill]]  ;;  %s332_s13 = int_to_ptr.vmem [resolvable:$true] %s331_s13 }
  0x11   : > { %p2715_p3 = pnand %p2019_p0, %p318_p2  ;;  %s2594_s18 = smov [#allocation7]  }
  0x12   : > { %s357_s19 = sshll.u32 %s2594_s18, 4  ;;  %s2595_s20 = smov 256   ;;  %s358_s19 = int_to_ptr.vmem [resolvable:$true] %s357_s19 }
  0x13   : > { %s329_s27 = sshll.u32 %s3318_s1, 4  ;;  %p2110_p4 = pneg %p2715_p3  ;;  %s330_s27 = int_to_ptr.hbm [resolvable:$true] %s329_s27 }
  0x14   : > { %s2596_s25 = smov 16   ;;  %s2597_s26 = smov 128  }
  0x15   : > { %p2726_p5 = pnand %p2110_p4, %p51_p1  ;;  %s2598_s30 = smov 8  }
  0x16   : > { %s355_s16 = sshll.u32 %s3320_s3, 4  ;;  %s384_s1 = sshll.u32 %s3306_s5, 4  ;;  %s356_s16 = int_to_ptr.hbm [resolvable:$true] %s355_s16  ;;  %s385_s1 = int_to_ptr.hbm [resolvable:$true] %s384_s1 }
  0x17   : > { %2113 = dma.hbm_to_vmem [thread:$0]  (!%p2726_p5), %s330_s27, 1024, %s332_s13, [#allocation5], %s2595_s20, %s2595_s20, %s2596_s25  }
  0x18   : > { %2119 = dma.hbm_to_vmem [thread:$0]  (!%p2726_p5), %s356_s16, 1536, %s358_s19, [#allocation8], %s2597_s26, %s2597_s26, %s2598_s30  }
  0x19   : > { %s2599_s3 = smov [#allocation10]   ;;  %s409_s13 = sshll.u32 %s3308_s7, 4  ;;  %s410_s13 = int_to_ptr.hbm [resolvable:$true] %s409_s13 }
  0x1a   : > { %s386_s18 = sshll.u32 %s2599_s3, 4  ;;  %s2600_s20 = smov [#allocation13]   ;;  %s387_s18 = int_to_ptr.vmem [resolvable:$true] %s386_s18 }
  0x1b   : > { %2125 = dma.hbm_to_vmem [thread:$0]  (!%p2726_p5), %s385_s1, 128, %s387_s18, [#allocation11]  }
  0x1c   : > { %s411_s25 = sshll.u32 %s2600_s20, 4  ;;  %s344_s19 = sshll.u32 %s3303_s2, 4  ;;  %s412_s25 = int_to_ptr.vmem [resolvable:$true] %s411_s25  ;;  %s345_s19 = int_to_ptr.hbm [resolvable:$true] %s344_s19 }
  0x1d   : > { %2131 = dma.hbm_to_vmem [thread:$0]  (!%p2726_p5), %s410_s13, 768, %s412_s25, [#allocation14], %s2597_s26, %s2597_s26, %s2598_s30  }
  0x1e   : > { %s369_s14 = sshll.u32 %s3305_s4, 4  ;;  %s2601_s1 = smov [#allocation6]   ;;  %s370_s14 = int_to_ptr.hbm [resolvable:$true] %s369_s14 }
  0x1f   : > { %s346_s15 = sshll.u32 %s2601_s1, 4  ;;  %s2602_s10 = smov [#allocation9]   ;;  %s347_s15 = int_to_ptr.vmem [resolvable:$true] %s346_s15 }
  0x20   : > { %2116 = dma.hbm_to_vmem [thread:$0]  (!%p2726_p5), %s345_s19, 32, %s347_s15, [#allocation5]  }
  0x21   : > { %s371_s18 = sshll.u32 %s2602_s10, 4  ;;  %s395_s16 = sshll.u32 %s3307_s6, 4  ;;  %s372_s18 = int_to_ptr.vmem [resolvable:$true] %s371_s18  ;;  %s396_s16 = int_to_ptr.hbm [resolvable:$true] %s395_s16 }
  0x22   : > { %2122 = dma.hbm_to_vmem [thread:$0]  (!%p2726_p5), %s370_s14, 1536, %s372_s18, [#allocation8], %s2597_s26, %s2597_s26, %s2598_s30  }
  0x23   : > { %s426_s3 = sshll.u32 %s3310_s9, 4  ;;  %s2603_s19 = smov [#allocation12]   ;;  %s427_s3 = int_to_ptr.hbm [resolvable:$true] %s426_s3 }
  0x24   : > { %s397_s12 = sshll.u32 %s2603_s19, 4  ;;  %s2604_s14 = smov [#allocation15]   ;;  %s398_s12 = int_to_ptr.vmem [resolvable:$true] %s397_s12 }
  0x25   : > { %2128 = dma.hbm_to_vmem [thread:$0]  (!%p2726_p5), %s396_s16, 768, %s398_s12, [#allocation11], %s2597_s26, %s2597_s26, %s2598_s30  }
  0x26   : > { %s428_s1 = sshll.u32 %s2604_s14, 4  ;;  %s443_s18 = sshll.u32 %s3312_s11, 4  ;;  %s429_s1 = int_to_ptr.vmem [resolvable:$true] %s428_s1  ;;  %s444_s18 = int_to_ptr.hbm [resolvable:$true] %s443_s18 }
  0x27   : > { %2134 = dma.hbm_to_vmem [thread:$0]  (!%p2726_p5), %s427_s3, 384, %s429_s1, [#allocation14], %s2597_s26, %s2597_s26, %s2598_s30  }
  0x28   : > { %s2605_s27 = smov [#allocation16]   ;;  %s2788_s16 = sadd.s32 1, %s2591_s24  }
  0x29   : > { %s445_s20 = sshll.u32 %s2605_s27, 4  ;;  %s34_s13 = ssub.s32 %s2591_s24, %s2788_s16  ;;  %s446_s20 = int_to_ptr.vmem [resolvable:$true] %s445_s20 }
  0x2a   : > { %2137 = dma.hbm_to_vmem [thread:$0]  (!%p2726_p5), %s444_s18, 384, %s446_s20, [#allocation17], %s2597_s26, %s2597_s26, %s2598_s30  }
  0x2b   : > { %s37_s25 = sadd.s32 1, %s2587_s23  ;;  %p35_p6 = scmp.eq.s32.totalorder %s34_s13, 0 }
  0x2c   : > { %p44_p7 = scmp.ne.s32.totalorder %s2587_s23, %s2583_s22  ;;  %p45_p8 = scmp.eq.s32.totalorder %s2591_s24, 0 }
  0x2d   : > { %p50_p9 = scmp.ne.s32.totalorder %s2583_s22, %s2579_s21  ;;  %p2151_p12 = scmp.lt.s32.totalorder %s2591_s24, 2 }
  0x2e   : > { %s2799_s3 = scalar_select %p35_p6, %s2587_s23, %s37_s25  }
  0x2f   : > { %p46_p10 = por %p45_p8, %p44_p7  ;;  %p2803_p11 = por %p51_p1, %p50_p9 }
  0x30   : > { %s459_s17 = sand.u32 1, %s2587_s23   ;;  %s465_s12 = scalar_lea.hbm %s3301_s0, %s2591_s24 }
  0x31   : > { %s462_s14 = scalar_lea.vmem [#allocation2], %s459_s17  ;;  %s467_s15 = sshll.u32 %s465_s12, 4  ;;  %s468_s15 = int_to_ptr.hbm [resolvable:$true] %s467_s15 }
  0x32   : > { %s469_s1 = sshll.u32 %s462_s14, 4  ;;  %p2813_p13 = pnand %p2151_p12, %p46_p10  ;;  %s470_s1 = int_to_ptr.vmem [resolvable:$true] %s469_s1 }
  0x33   : > { %s460_s10 = scalar_lea.sflag [#allocation3], %s459_s17  ;;  %s2507_s18 = sshra.s32 %s468_s15, 4  ;;  %s2508_s18 = int_to_ptr.hbm [resolvable:$true] %s2507_s18 }
  0x34   : > { %s2509_s27 = scalar_lea.hbm %s2508_s18, 1  ;;  %p2511_p2 = pneg %p2813_p13 }
  0x35   : > { %p2510_p0 = scmp.ne.s32.totalorder %s2508_s18, %s2509_s27  ;;  %s2514_s13 = scalar_lea.hbm %s3301_s0, 2 }
  0x36   : > { %p2515_p6 = scmp.lt.s32.totalorder %s2508_s18, %s3301_s0  ;;  %p2516_p7 = scmp.lt.s32.totalorder %s2514_s13, %s2509_s27 }
  0x37   : > { %p2512_p4 = pnand %p2511_p2, %p2510_p0 }
  0x38   : > { %p2517_p8 = por %p2516_p7, %p2515_p6 }
  0x39   : > { %p2513_p5 = pneg %p2512_p4 }
  0x3b   : > { %p2518_p9 = pnand %p2517_p8, %p2513_p5 }
  0x3d   : > { %2521 = shalt.err (!%p2518_p9)
}
  0x3e   : > { %2141 = dma.hbm_to_vmem [thread:$0]  (!%p2813_p13), %s468_s15, 16, %s470_s1, %s460_s10  }
  0x3f   : > { %478 = sbr.rel (%p2715_p3) target bundleno = 2851 (0xb23), region = 68  ;;  %s480_s17 = sand.u32 (!%p2715_p3), 1, %s2583_s22  }
  0x40   : > { %s481_s30 = scalar_lea.sflag (!%p2715_p3), [#allocation3], %s480_s17  ;;  %s483_s12 = scalar_lea.vmem (!%p2715_p3), [#allocation2], %s480_s17 }
  0x44   : > { %2554 = dma.done.wait (%p2803_p11), %s481_s30, 16  }
  0x45   : > { %2556 = vsyncadd (%p2803_p11), %s481_s30, 4294967280 }
  0x46   : > { %2558 = dma.done.wait (%p51_p1), [#allocation5], 1056  }
  0x47   : > { %2560 = vsyncadd (%p51_p1), [#allocation5], 4294966240 }
  0x48   : > { %2562 = dma.done.wait (%p51_p1), [#allocation8], 3072  }
  0x49   : > { %2564 = vsyncadd (%p51_p1), [#allocation8], 4294964224 }
  0x4a   : > { %2566 = dma.done.wait (%p51_p1), [#allocation11], 896  }
  0x4b   : > { %2568 = vsyncadd (%p51_p1), [#allocation11], 4294966400 }
  0x4c   : > { %2570 = dma.done.wait (%p51_p1), [#allocation14], 1152  }
  0x4d   : > { %2572 = vsyncadd (%p51_p1), [#allocation14], 4294966144 }
  0x4e   : > { %2574 = dma.done.wait (%p51_p1), [#allocation17], 384  }
  0x4f   : > { %2576 = vsyncadd (%p51_p1), [#allocation17], 4294966912  ;;  %v579_v0 = vld [vmem:[#allocation4 + $0x30] sm:$0xff]  ;;  %v577_v1 = vld [vmem:[#allocation4 + $0x20] sm:$0xff]  ;;  %vm587_vm0 = vcmask 261120   ;;  %s2606_s29 = smov 32  }
  0x50   : > { %v580_v2 = vld [vmem:[#allocation4 + $0x38] sm:$0xff]  ;;  %603 = vmatpush.msra.mxu0 %v579_v0  ;;  %v578_v3 = vld [vmem:[#allocation4 + $0x28] sm:$0xff]  ;;  %v575_v4 = vld [vmem:[#allocation4 + $0x10] sm:$0xff]  ;;  %s2607_s19 = smov 96   ;;  %s2608_s14 = smov 64   ;;  %vm659_vm1 = vcmask 1040384  }
  0x51   : > { %623 = vmatpush.msra.mxu1 %v580_v2  ;;  %v576_v5 = vld [vmem:[#allocation4 + $0x18] sm:$0xff]  ;;  %v573_v6 = vld [vmem:[#allocation4] sm:$0xff]  ;;  %v574_v7 = vld [vmem:[#allocation4 + $0x8] sm:$0xff]  ;;  %vm661_vm2 = vcmask 1041408   ;;  %vm663_vm3 = vcmask 1042432   ;;  %vm665_vm4 = vcmask 1043456  }
  0x52   : > { %604 = vmatpush.msra.mxu0 %v577_v1  ;;  %v572_v8 = vld [vmem:[%s483_s12] sm:$0x1]  ;;  %v581_v9 = vld [vmem:[#allocation6] sm:$0x3]  ;;  %v696_v23 = vld [vmem:[#allocation7 + $0x50] sm:$0xff]  ;;  %vm667_vm5 = vcmask 1044480  }
  0x53   : > { %624 = vmatpush.msra.mxu1 %v578_v3  ;;  %v583_v10 = vperm.slane %v581_v9, 0  ;;  %v584_v11 = vperm.slane %v581_v9, 1  ;;  %v697_v22 = vld [vmem:[#allocation7 + $0x58] sm:$0xff]  ;;  %v695_v24 = vld [vmem:[#allocation7 + $0x48] sm:$0xff]  ;;  %v694_v25 = vld [vmem:[#allocation7 + $0x40] sm:$0xff]  ;;  %vm669_vm6 = vcmask 1045504  }
  0x54   : > { %605 = vmatpush.msra.mxu0 %v575_v4  ;;  %723 = vmatpush.msra.mxu2 %v697_v22  ;;  %v693_v26 = vld [vmem:[#allocation7 + $0x38] sm:$0xff]  ;;  %v692_v27 = vld [vmem:[#allocation7 + $0x30] sm:$0xff]  ;;  %v691_v28 = vld [vmem:[#allocation7 + $0x28] sm:$0xff]  ;;  %vm671_vm7 = vcmask 1046528   ;;  %vm713_vm8 = vcmask 523264   ;;  %vm715_vm9 = vcmask 785408  }
  0x55   : > { %625 = vmatpush.msra.mxu1 %v576_v5  ;;  %v690_v29 = vld [vmem:[#allocation7 + $0x20] sm:$0xff]  ;;  %v689_v31 = vld [vmem:[#allocation7 + $0x18] sm:$0xff]  ;;  %v688_v33 = vld [vmem:[#allocation7 + $0x10] sm:$0xff]  ;;  %s2609_s1 = smov 112   ;;  %s2610_s15 = smov 16   ;;  %vm830_vm12 = vcmask 130048  }
  0x56   : > { %606 = vmatpush.msra.mxu0 %v573_v6  ;;  %724 = vmatpush.msra.mxu2 %v696_v23  ;;  %v687_v48 = vld [vmem:[#allocation7 + $0x8] sm:$0xff]  ;;  %v686_v49 = vld [vmem:[#allocation7] sm:$0xff]  ;;  %vm835_vm13 = vcmask 392192   ;;  %s2611_s21 = smov 120   ;;  %s2612_s27 = smov 8  }
  0x57   : > { %626 = vmatpush.msra.mxu1 %v574_v7  ;;  %2041 = vmatmul.msk.f32.vlgmr.msra.gmra.mxu0 %vm587_vm0, %v572_v8  ;;  %v2885_v2 = vld [vmem:[#allocation10] sm:$0x3f]  ;;  %s3324_s13 = sld [smem:[#allocation26_spill]]  ;;  %s2613_s25 = smov 24  }
  0x58   : > { %2042 = vmatmul.msk.f32.vlgmr.msra.gmra.mxu1 %vm587_vm0, %v572_v8  ;;  %725 = vmatpush.msra.mxu2 %v695_v24  ;;  %v792_v9 = vperm.slane %v2885_v2, 0  ;;  %s2614_s26 = smov 48   ;;  %s2615_s17 = smov 40  }
  0x59   : > { %s2616_s30 = smov 72   ;;  %s2617_s12 = smov 56  }
  0x5a   : > { %726 = vmatpush.msra.mxu2 %v694_v25  ;;  %s2618_s10 = smov 88   ;;  %s2619_s18 = smov 104  }
  0x5b   : > { %s2620_s24 = smov 80   ;;  %p568_p1 = scmp.lt.s32.totalorder %s2710_s28, 1 }
  0x5c   : > { %727 = vmatpush.msra.mxu2 %v693_v26 }
  0x5d   : > { %s3331_s28 = smov (!%p568_p1, %s2710_s28), 1 }
  0x5e   : > { %728 = vmatpush.msra.mxu2 %v692_v27 }
  0x60   : > { %729 = vmatpush.msra.mxu2 %v691_v28 }
  0x62   : > { %730 = vmatpush.msra.mxu2 %v690_v29 }
  0x64   : > { %731 = vmatpush.msra.mxu2 %v689_v31 }
  0x66   : > { %732 = vmatpush.msra.mxu2 %v688_v33 }
  0x68   : > { %733 = vmatpush.msra.mxu2 %v687_v48 }
  0x6a   : > { %734 = vmatpush.msra.mxu2 %v686_v49 }
  0xd4   : > { %v608_v12 = vpop.f32.mrf.mxu0 }
  0xd5   : > { %v628_v13 = vpop.f32.mrf.mxu1  ;;  %v609_v14 = vadd.f32 %v608_v12, %v583_v10  ;;  %v795_v12 = vperm.slane %v2885_v2, 1 }
  0xd6   : > { %v629_v15 = vadd.f32 %v628_v13, %v584_v11 }
  0xd7   : > { %v640_v16 = vrot.slane %v609_v14, 5  ;;  %v632_v17 = vrot.slane %v609_v14, 7  ;;  %v636_v21 = vrot.slane %v609_v14, 6 }
  0xd8   : > { %v651_v18 = vrot.slane %v629_v15, 2  ;;  %v647_v19 = vrot.slane %v629_v15, 3  ;;  %v655_v20 = vrot.slane %v629_v15, 1  ;;  %v645_v38 = vrot.slane %v629_v15, 4 }
  0xd9   : > { %641 = vrot.lane.b32.xlu1 %v640_v16, %s2606_s29  ;;  %633 = vrot.lane.b32.xlu0 %v632_v17, %s2607_s19 }
  0xda   : > { %652 = vrot.lane.b32.xlu2 %v651_v18, %s2608_s14 }
  0xe1   : > { %637 = vrot.lane.b32.xlu0 %v636_v21, %s2608_s14  ;;  %648 = vrot.lane.b32.xlu1 %v647_v19, %s2607_s19 }
  0xe2   : > { %656 = vrot.lane.b32.xlu2 %v655_v20, %s2606_s29 }
 0x134   : > { %v653_v34 = vpop.permute.xlu2 %652 }
 0x13c   : > { %v657_v43 = vpop.permute.xlu2 %656 }
 0x14b   : > { %v634_v30 = vpop.permute.xlu0 %633  ;;  %v642_v32 = vpop.permute.xlu1 %641 }
 0x14c   : > { %v660_v35 = vsel %vm659_vm1, %v609_v14, %v634_v30 }
 0x153   : > { %v638_v36 = vpop.permute.xlu0 %637  ;;  %v649_v39 = vpop.permute.xlu1 %648 }
 0x154   : > { %v662_v37 = vsel %vm661_vm2, %v660_v35, %v638_v36 }
 0x155   : > { %v664_v40 = vsel %vm663_vm3, %v662_v37, %v642_v32 }
 0x156   : > { %v666_v41 = vsel %vm665_vm4, %v664_v40, %v645_v38  ;;  %v678_v40 = vld [vmem:[#allocation9 + $0x28] sm:$0xff] }
 0x157   : > { %v668_v42 = vsel %vm667_vm5, %v666_v41, %v649_v39  ;;  %v677_v41 = vld [vmem:[#allocation9 + $0x20] sm:$0xff]  ;;  %852 = vmatpush.msra.mxu3 %v678_v40 }
 0x158   : > { %v670_v44 = vsel %vm669_vm6, %v668_v42, %v653_v34  ;;  %v676_v42 = vld [vmem:[#allocation9 + $0x18] sm:$0xff] }
 0x159   : > { %v672_v45 = vsel %vm671_vm7, %v670_v44, %v657_v43  ;;  %853 = vmatpush.msra.mxu3 %v677_v41  ;;  %v675_v43 = vld [vmem:[#allocation9 + $0x10] sm:$0xff]  ;;  %v674_v44 = vld [vmem:[#allocation9 + $0x8] sm:$0xff] }
 0x15a   : > { %705 = vrot.lane.b32.xlu0 %v672_v45, %s2606_s29  ;;  %v702_v46 = vrot.slane %v672_v45, 7  ;;  %v699_v50 = vrot.slane %v672_v45, 1  ;;  %v673_v45 = vld [vmem:[#allocation9] sm:$0xff] }
 0x15b   : > { %854 = vmatpush.msra.mxu3 %v676_v42 }
 0x15c   : > { %v704_v47 = vsel %vm659_vm1, 0.0, %v702_v46  ;;  %v701_v52 = vsel %vm671_vm7, %v699_v50, 0.0 }
 0x15d   : > { %709 = vrot.lane.b32.xlu1 %v704_v47, %s2608_s14  ;;  %855 = vmatpush.msra.mxu3 %v675_v43 }
 0x15f   : > { %856 = vmatpush.msra.mxu3 %v674_v44 }
 0x161   : > { %857 = vmatpush.msra.mxu3 %v673_v45 }
 0x1cc   : > { %v706_v51 = vpop.permute.xlu0 %705 }
 0x1cd   : > { %v712_v53 = vsel %vm587_vm0, %v701_v52, %v706_v51 }
 0x1cf   : > { %v710_v54 = vpop.permute.xlu1 %709 }
 0x1d0   : > { %v714_v55 = vsel %vm713_vm8, %v712_v53, %v710_v54 }
 0x1d1   : > { %2043 = vmatmul.msk.f32.vlgmr.msra.gmra.mxu2 %vm715_vm9, %v714_v55  ;;  %v865_v55 = vperm.slane %v2885_v2, 2 }
 0x254   : > { %v736_v56 = vpop.f32.mrf.mxu2 }
 0x255   : > { %v750_v57 = vrot.slane %v736_v56, 5  ;;  %v745_v58 = vrot.slane %v736_v56, 6  ;;  %v740_v59 = vrot.slane %v736_v56, 7  ;;  %v765_v60 = vrot.slane %v736_v56, 2 }
 0x256   : > { %v760_v61 = vrot.slane %v736_v56, 3  ;;  %v755_v62 = vrot.slane %v736_v56, 4  ;;  %v770_v63 = vrot.slane %v736_v56, 1 }
 0x257   : > { %751 = vrot.lane.b32.xlu1 %v750_v57, %s2609_s1  ;;  %746 = vrot.lane.b32.xlu0 %v745_v58, %s2609_s1 }
 0x258   : > { %741 = vrot.lane.b32.xlu2 %v740_v59, %s2609_s1 }
 0x25f   : > { %766 = vrot.lane.b32.xlu1 %v765_v60, %s2609_s1  ;;  %761 = vrot.lane.b32.xlu0 %v760_v61, %s2609_s1 }
 0x260   : > { %756 = vrot.lane.b32.xlu2 %v755_v62, %s2609_s1 }
 0x267   : > { %775 = vrot.lane.b32.xlu0 %v736_v56, %s2609_s1 }
 0x268   : > { %771 = vrot.lane.b32.xlu2 %v770_v63, %s2609_s1 }
 0x2b2   : > { %v742_v0 = vpop.permute.xlu2 %741 }
 0x2b3   : > { %v778_v1 = vsel %vm659_vm1, %v736_v56, %v742_v0  ;;  %v868_v56 = vperm.slane %v2885_v2, 3 }
 0x2b4   : > { %v779_v5 = vsel %vm661_vm2, %v778_v1, %v740_v59 }
 0x2ba   : > { %v757_v7 = vpop.permute.xlu2 %756 }
 0x2c2   : > { %v772_v22 = vpop.permute.xlu2 %771 }
 0x2c9   : > { %v752_v3 = vpop.permute.xlu1 %751  ;;  %v747_v4 = vpop.permute.xlu0 %746 }
 0x2ca   : > { %v780_v6 = vsel %vm663_vm3, %v779_v5, %v747_v4 }
 0x2cb   : > { %v781_v8 = vsel %vm665_vm4, %v780_v6, %v745_v58 }
 0x2cc   : > { %v782_v10 = vsel %vm667_vm5, %v781_v8, %v752_v3 }
 0x2cd   : > { %v783_v11 = vsel %vm669_vm6, %v782_v10, %v750_v57 }
 0x2ce   : > { %v784_v13 = vsel %vm671_vm7, %v783_v11, %v757_v7  ;;  %v684_v11 = vld [vmem:[#allocation9 + $0x58] sm:$0xff] }
 0x2cf   : > { %v793_v14 = vmul.f32 %v792_v9, %v784_v13  ;;  %923 = vmatpush.msrb.mxu0 %v684_v11  ;;  %v682_v13 = vld [vmem:[#allocation9 + $0x48] sm:$0xff] }
 0x2d1   : > { %v762_v15 = vpop.permute.xlu0 %761  ;;  %v2895_v16 = vadd.f32 %v795_v12, %v793_v14  ;;  %v767_v18 = vpop.permute.xlu1 %766  ;;  %v681_v14 = vld [vmem:[#allocation9 + $0x40] sm:$0xff] }
 0x2d2   : > { %v785_v17 = vsel %vm659_vm1, %v755_v62, %v762_v15  ;;  %v680_v15 = vld [vmem:[#allocation9 + $0x38] sm:$0xff] }
 0x2d3   : > { %v786_v19 = vsel %vm661_vm2, %v785_v17, %v760_v61  ;;  %vm798_vm10 = vcmp.ge.f32.partialorder %v2895_v16, 0.0  ;;  %v800_v20 = vmul.f32 0.02, %v2895_v16  ;;  %v679_v17 = vld [vmem:[#allocation9 + $0x30] sm:$0xff] }
 0x2d4   : > { %v787_v21 = vsel %vm663_vm3, %v786_v19, %v767_v18 }
 0x2d5   : > { %v802_v23 = vsel %vm798_vm10, %v2895_v16, %v800_v20  ;;  %v788_v24 = vsel %vm665_vm4, %v787_v21, %v765_v60 }
 0x2d6   : > { %817 = vrot.lane.b32.xlu1 %v802_v23, %s2610_s15  ;;  %v789_v25 = vsel %vm667_vm5, %v788_v24, %v772_v22  ;;  %v812_v26 = vrot.slane %v802_v23, 7  ;;  %v806_v35 = vrot.slane %v802_v23, 1 }
 0x2d7   : > { %v790_v29 = vsel %vm669_vm6, %v789_v25, %v770_v63 }
 0x2d8   : > { %v816_v27 = vsel %vm659_vm1, 0.0, %v812_v26 }
 0x2d9   : > { %v776_v28 = vpop.permute.xlu0 %775  ;;  %824 = vrot.lane.b32.xlu2 %v816_v27, %s2606_s29  ;;  %v936_v27 = vperm.slane %v2885_v2, 4 }
 0x2da   : > { %v791_v30 = vsel %vm671_vm7, %v790_v29, %v776_v28  ;;  %v939_v28 = vperm.slane %v2885_v2, 5 }
 0x2db   : > { %v794_v31 = vmul.f32 %v792_v9, %v791_v30 }
 0x2dd   : > { %v2910_v32 = vadd.f32 %v795_v12, %v794_v31  ;;  %v683_v12 = vld [vmem:[#allocation9 + $0x50] sm:$0xff] }
 0x2de   : > { %924 = vmatpush.msrb.mxu0 %v683_v12 }
 0x2df   : > { %vm799_vm11 = vcmp.ge.f32.partialorder %v2910_v32, 0.0  ;;  %v801_v33 = vmul.f32 0.02, %v2910_v32 }
 0x2e0   : > { %925 = vmatpush.msrb.mxu0 %v682_v13 }
 0x2e1   : > { %v803_v34 = vsel %vm799_vm11, %v2910_v32, %v801_v33 }
 0x2e2   : > { %819 = vrot.lane.b32.xlu0 %v803_v34, %s2610_s15  ;;  %v807_v36 = vrot.slane %v803_v34, 1  ;;  %v813_v37 = vrot.slane %v803_v34, 7  ;;  %926 = vmatpush.msrb.mxu0 %v681_v14 }
 0x2e4   : > { %v814_v38 = vsel %vm659_vm1, %v812_v26, %v813_v37  ;;  %v808_v39 = vsel %vm671_vm7, %v806_v35, %v807_v36  ;;  %v811_v51 = vsel %vm671_vm7, %v807_v36, 0.0  ;;  %927 = vmatpush.msrb.mxu0 %v680_v15 }
 0x2e5   : > { %826 = vrot.lane.b32.xlu1 %v814_v38, %s2606_s29 }
 0x2e6   : > { %928 = vmatpush.msrb.mxu0 %v679_v17 }
 0x333   : > { %v825_v47 = vpop.permute.xlu2 %824 }
 0x348   : > { %v818_v46 = vpop.permute.xlu1 %817 }
 0x349   : > { %v831_v48 = vsel %vm830_vm12, %v808_v39, %v818_v46 }
 0x34a   : > { %v833_v49 = vsel %vm587_vm0, %v831_v48, %v825_v47  ;;  %v962_v47 = vld [vmem:[#allocation12 + $0x28] sm:$0xff]  ;;  %v961_v48 = vld [vmem:[#allocation12 + $0x20] sm:$0xff] }
 0x34b   : > { %2044 = vmatmul.msk.f32.vlgmr.msra.gmra.mxu3 %vm835_vm13, %v833_v49  ;;  %1009 = vmatpush.msrb.mxu1 %v962_v47  ;;  %v960_v49 = vld [vmem:[#allocation12 + $0x18] sm:$0xff] }
 0x34d   : > { %1010 = vmatpush.msrb.mxu1 %v961_v48 }
 0x34f   : > { %1011 = vmatpush.msrb.mxu1 %v960_v49 }
 0x354   : > { %v820_v50 = vpop.permute.xlu0 %819 }
 0x355   : > { %v832_v52 = vsel %vm830_vm12, %v811_v51, %v820_v50  ;;  %v958_v50 = vld [vmem:[#allocation12 + $0x8] sm:$0xff]  ;;  %v957_v51 = vld [vmem:[#allocation12] sm:$0xff] }
 0x357   : > { %v827_v53 = vpop.permute.xlu1 %826 }
 0x358   : > { %v834_v54 = vsel %vm587_vm0, %v832_v52, %v827_v53 }
 0x359   : > { %2045 = vmatmul.msk.f32.gmra.mxu3 %vm835_vm13, %v834_v54 }
 0x3ce   : > { %v859_v57 = vpop.f32.mrf.mxu3 }
 0x3cf   : > { %v866_v58 = vmul.f32 %v865_v55, %v859_v57 }
 0x3d1   : > { %v869_v59 = vadd.f32 %v868_v56, %v866_v58 }
 0x3d3   : > { %vm871_vm14 = vcmp.ge.f32.partialorder %v869_v59, 0.0  ;;  %v873_v60 = vmul.f32 0.02, %v869_v59 }
 0x3d5   : > { %v875_v61 = vsel %vm871_vm14, %v869_v59, %v873_v60 }
 0x3d6   : > { %890 = vrot.lane.b32.xlu2 %v875_v61, %s2610_s15  ;;  %v885_v62 = vrot.slane %v875_v61, 7  ;;  %v879_v6 = vrot.slane %v875_v61, 1 }
 0x3d8   : > { %v889_v63 = vsel %vm659_vm1, 0.0, %v885_v62 }
 0x3d9   : > { %897 = vrot.lane.b32.xlu0 %v889_v63, %s2606_s29 }
 0x3dc   : > { %v862_v0 = vpop.f32.mrf.mxu3 }
 0x3dd   : > { %v867_v1 = vmul.f32 %v865_v55, %v862_v0 }
 0x3df   : > { %v870_v3 = vadd.f32 %v868_v56, %v867_v1 }
 0x3e1   : > { %vm872_vm15 = vcmp.ge.f32.partialorder %v870_v3, 0.0  ;;  %v874_v4 = vmul.f32 0.02, %v870_v3 }
 0x3e3   : > { %v876_v5 = vsel %vm872_vm15, %v870_v3, %v874_v4 }
 0x3e4   : > { %892 = vrot.lane.b32.xlu1 %v876_v5, %s2610_s15  ;;  %v880_v7 = vrot.slane %v876_v5, 1  ;;  %v886_v8 = vrot.slane %v876_v5, 7 }
 0x3e6   : > { %v887_v9 = vsel %vm659_vm1, %v885_v62, %v886_v8  ;;  %v881_v10 = vsel %vm671_vm7, %v879_v6, %v880_v7  ;;  %v884_v23 = vsel %vm671_vm7, %v880_v7, 0.0 }
 0x3e7   : > { %899 = vrot.lane.b32.xlu2 %v887_v9, %s2606_s29 }
 0x430   : > { %v891_v18 = vpop.permute.xlu2 %890 }
 0x431   : > { %v903_v19 = vsel %vm830_vm12, %v881_v10, %v891_v18 }
 0x441   : > { %v900_v24 = vpop.permute.xlu2 %899 }
 0x44b   : > { %v898_v20 = vpop.permute.xlu0 %897 }
 0x44c   : > { %v905_v21 = vsel %vm587_vm0, %v903_v19, %v898_v20 }
 0x44d   : > { %2046 = vmatmul.msk.f32.vlgmr.msrb.gmra.mxu0 %vm835_vm13, %v905_v21  ;;  %v3013_v21 = vld [vmem:[%s3309_s8] sm:$0x3f] }
 0x456   : > { %v893_v22 = vpop.permute.xlu1 %892 }
 0x457   : > { %v904_v25 = vsel %vm830_vm12, %v884_v23, %v893_v22 }
 0x458   : > { %v906_v26 = vsel %vm587_vm0, %v904_v25, %v900_v24  ;;  %v3018_v25 = vperm.slane %v3013_v21, 0 }
 0x459   : > { %2047 = vmatmul.msk.f32.gmra.mxu0 %vm835_vm13, %v906_v26 }
 0x4ca   : > { %v930_v29 = vpop.f32.mrf.mxu0 }
 0x4cb   : > { %v937_v30 = vmul.f32 %v936_v27, %v930_v29 }
 0x4cd   : > { %v940_v31 = vadd.f32 %v939_v28, %v937_v30 }
 0x4cf   : > { %v942_v33 = vadd.f32 %v940_v31, %v2895_v16 }
 0x4d1   : > { %vm944_vm10 = vcmp.ge.f32.partialorder %v942_v33, 0.0  ;;  %v946_v34 = vmul.f32 0.02, %v942_v33 }
 0x4d3   : > { %v948_v35 = vsel %vm944_vm10, %v942_v33, %v946_v34 }
 0x4d4   : > { %976 = vrot.lane.b32.xlu0 %v948_v35, %s2610_s15  ;;  %v971_v36 = vrot.slane %v948_v35, 7  ;;  %v965_v43 = vrot.slane %v948_v35, 1 }
 0x4d6   : > { %v933_v37 = vpop.f32.mrf.mxu0  ;;  %v975_v38 = vsel %vm659_vm1, 0.0, %v971_v36 }
 0x4d7   : > { %v938_v39 = vmul.f32 %v936_v27, %v933_v37  ;;  %983 = vrot.lane.b32.xlu1 %v975_v38, %s2606_s29 }
 0x4d9   : > { %v941_v40 = vadd.f32 %v939_v28, %v938_v39  ;;  %v3022_v28 = vperm.slane %v3013_v21, 1 }
 0x4db   : > { %v943_v2 = vadd.f32 %v941_v40, %v2910_v32  ;;  %v959_v32 = vld [vmem:[#allocation12 + $0x10] sm:$0xff] }
 0x4dc   : > { %1012 = vmatpush.msrb.mxu1 %v959_v32 }
 0x4dd   : > { %vm945_vm11 = vcmp.ge.f32.partialorder %v943_v2, 0.0  ;;  %v947_v41 = vmul.f32 0.02, %v943_v2 }
 0x4de   : > { %1013 = vmatpush.msrb.mxu1 %v958_v50 }
 0x4df   : > { %v949_v42 = vsel %vm945_vm11, %v943_v2, %v947_v41 }
 0x4e0   : > { %978 = vrot.lane.b32.xlu2 %v949_v42, %s2610_s15  ;;  %v966_v16 = vrot.slane %v949_v42, 1  ;;  %v972_v44 = vrot.slane %v949_v42, 7  ;;  %1014 = vmatpush.msrb.mxu1 %v957_v51 }
 0x4e2   : > { %v973_v45 = vsel %vm659_vm1, %v971_v36, %v972_v44  ;;  %v967_v46 = vsel %vm671_vm7, %v965_v43, %v966_v16  ;;  %v970_v57 = vsel %vm671_vm7, %v966_v16, 0.0 }
 0x4e3   : > { %985 = vrot.lane.b32.xlu0 %v973_v45, %s2606_s29 }
 0x53a   : > { %v979_v56 = vpop.permute.xlu2 %978 }
 0x53b   : > { %v990_v58 = vsel %vm830_vm12, %v970_v57, %v979_v56 }
 0x546   : > { %v977_v52 = vpop.permute.xlu0 %976 }
 0x547   : > { %v989_v53 = vsel %vm830_vm12, %v967_v46, %v977_v52 }
 0x549   : > { %v984_v54 = vpop.permute.xlu1 %983 }
 0x54a   : > { %v991_v55 = vsel %vm587_vm0, %v989_v53, %v984_v54 }
 0x54b   : > { %2048 = vmatmul.msk.f32.vlgmr.msrb.gmra.mxu1 %vm835_vm13, %v991_v55 }
 0x555   : > { %v986_v59 = vpop.permute.xlu0 %985 }
 0x556   : > { %v992_v60 = vsel %vm587_vm0, %v990_v58, %v986_v59 }
 0x557   : > { %2049 = vmatmul.msk.f32.gmra.mxu1 %vm835_vm13, %v992_v60 }
 0x5c8   : > { %v2960_v61 = vpop.f32.mrf.mxu1 }
 0x5c9   : > { %v1033_v62 = vrot.slane %v2960_v61, 5  ;;  %v1028_v63 = vrot.slane %v2960_v61, 6  ;;  %v1023_v0 = vrot.slane %v2960_v61, 7  ;;  %v1048_v1 = vrot.slane %v2960_v61, 2 }
 0x5ca   : > { %v1043_v3 = vrot.slane %v2960_v61, 3  ;;  %v1038_v4 = vrot.slane %v2960_v61, 4  ;;  %v1053_v7 = vrot.slane %v2960_v61, 1 }
 0x5cb   : > { %1034 = vrot.lane.b32.xlu0 %v1033_v62, %s2611_s21  ;;  %1029 = vrot.lane.b32.xlu2 %v1028_v63, %s2611_s21 }
 0x5cc   : > { %1024 = vrot.lane.b32.xlu1 %v1023_v0, %s2611_s21 }
 0x5d3   : > { %1049 = vrot.lane.b32.xlu0 %v1048_v1, %s2611_s21  ;;  %1044 = vrot.lane.b32.xlu2 %v1043_v3, %s2611_s21 }
 0x5d4   : > { %1039 = vrot.lane.b32.xlu1 %v1038_v4, %s2611_s21  ;;  %v2974_v5 = vpop.f32.mrf.mxu1 }
 0x5d5   : > { %v1076_v6 = vrot.slane %v2974_v5, 7  ;;  %v1086_v8 = vrot.slane %v2974_v5, 5  ;;  %v1091_v9 = vrot.slane %v2974_v5, 4  ;;  %v1081_v10 = vrot.slane %v2974_v5, 6 }
 0x5d6   : > { %v1101_v11 = vrot.slane %v2974_v5, 2  ;;  %v1106_v12 = vrot.slane %v2974_v5, 1  ;;  %v1096_v13 = vrot.slane %v2974_v5, 3 }
 0x5db   : > { %1058 = vrot.lane.b32.xlu2 %v2960_v61, %s2611_s21  ;;  %1077 = vrot.lane.b32.xlu0 %v1076_v6, %s2611_s21 }
 0x5dc   : > { %1054 = vrot.lane.b32.xlu1 %v1053_v7, %s2611_s21 }
 0x5e3   : > { %1087 = vrot.lane.b32.xlu2 %v1086_v8, %s2611_s21  ;;  %1092 = vrot.lane.b32.xlu0 %v1091_v9, %s2611_s21 }
 0x5e4   : > { %1082 = vrot.lane.b32.xlu1 %v1081_v10, %s2611_s21 }
 0x5eb   : > { %1102 = vrot.lane.b32.xlu2 %v1101_v11, %s2611_s21  ;;  %1107 = vrot.lane.b32.xlu0 %v1106_v12, %s2611_s21 }
 0x5ec   : > { %1097 = vrot.lane.b32.xlu1 %v1096_v13, %s2611_s21 }
 0x5f4   : > { %1111 = vrot.lane.b32.xlu1 %v2974_v5, %s2611_s21 }
 0x625   : > { %v1030_v14 = vpop.permute.xlu2 %1029 }
 0x62d   : > { %v1045_v22 = vpop.permute.xlu2 %1044 }
 0x62e   : > { %v1068_v30 = vsel %vm659_vm1, %v1038_v4, %v1045_v22 }
 0x62f   : > { %v1069_v34 = vsel %vm661_vm2, %v1068_v30, %v1043_v3 }
 0x635   : > { %v1059_v37 = vpop.permute.xlu2 %1058 }
 0x63d   : > { %v1035_v15 = vpop.permute.xlu0 %1034  ;;  %v1088_v49 = vpop.permute.xlu2 %1087 }
 0x63e   : > { %v1025_v17 = vpop.permute.xlu1 %1024 }
 0x63f   : > { %v1061_v18 = vsel %vm659_vm1, %v2960_v61, %v1025_v17 }
 0x640   : > { %v1062_v19 = vsel %vm661_vm2, %v1061_v18, %v1023_v0 }
 0x641   : > { %v1063_v20 = vsel %vm663_vm3, %v1062_v19, %v1030_v14 }
 0x642   : > { %v1064_v23 = vsel %vm665_vm4, %v1063_v20, %v1028_v63 }
 0x643   : > { %v1065_v24 = vsel %vm667_vm5, %v1064_v23, %v1035_v15 }
 0x644   : > { %v1066_v27 = vsel %vm669_vm6, %v1065_v24, %v1033_v62 }
 0x645   : > { %v1050_v26 = vpop.permute.xlu0 %1049 }
 0x646   : > { %v1040_v29 = vpop.permute.xlu1 %1039  ;;  %v1070_v36 = vsel %vm663_vm3, %v1069_v34, %v1050_v26 }
 0x647   : > { %v1067_v31 = vsel %vm671_vm7, %v1066_v27, %v1040_v29  ;;  %v1071_v39 = vsel %vm665_vm4, %v1070_v36, %v1048_v1 }
 0x648   : > { %v1129_v33 = vmul.f32 %v3018_v25, %v1067_v31 }
 0x64a   : > { %v3029_v35 = vadd.f32 %v3022_v28, %v1129_v33  ;;  %v950_v33 = vld [vmem:[#allocation13] sm:$0xff] }
 0x64c   : > { %vm1138_vm14 = vcmp.ge.f32.partialorder %v3029_v35, 0.0  ;;  %v1142_v38 = vmul.f32 0.02, %v3029_v35 }
 0x64d   : > { %v1078_v2 = vpop.permute.xlu0 %1077 }
 0x64e   : > { %v1055_v40 = vpop.permute.xlu1 %1054  ;;  %v1146_v41 = vsel %vm1138_vm14, %v3029_v35, %v1142_v38  ;;  %v1114_v47 = vsel %vm659_vm1, %v2974_v5, %v1078_v2 }
 0x64f   : > { %v1072_v42 = vsel %vm667_vm5, %v1071_v39, %v1055_v40  ;;  %1175 = vrot.lane.b32.xlu2 %v1146_v41, %s2612_s27  ;;  %v1166_v43 = vrot.slane %v1146_v41, 7  ;;  %v1115_v50 = vsel %vm661_vm2, %v1114_v47, %v1076_v6  ;;  %v1154_v56 = vrot.slane %v1146_v41, 1  ;;  %v1103_v6 = vpop.permute.xlu2 %1102 }
 0x650   : > { %v1073_v16 = vsel %vm669_vm6, %v1072_v42, %v1053_v7 }
 0x651   : > { %v1074_v44 = vsel %vm671_vm7, %v1073_v16, %v1059_v37  ;;  %v1174_v45 = vsel %vm659_vm1, 0.0, %v1166_v43 }
 0x652   : > { %v1130_v46 = vmul.f32 %v3018_v25, %v1074_v44  ;;  %1188 = vrot.lane.b32.xlu0 %v1174_v45, %s2610_s15 }
 0x654   : > { %v3046_v48 = vadd.f32 %v3022_v28, %v1130_v46 }
 0x655   : > { %v1093_v54 = vpop.permute.xlu0 %1092 }
 0x656   : > { %v1083_v32 = vpop.permute.xlu1 %1082  ;;  %vm1139_vm15 = vcmp.ge.f32.partialorder %v3046_v48, 0.0  ;;  %v1143_v51 = vmul.f32 0.02, %v3046_v48 }
 0x657   : > { %v1116_v52 = vsel %vm663_vm3, %v1115_v50, %v1083_v32  ;;  %v1251_v50 = vperm.slane %v3013_v21, 2 }
 0x658   : > { %v1117_v53 = vsel %vm665_vm4, %v1116_v52, %v1081_v10  ;;  %v1147_v55 = vsel %vm1139_vm15, %v3046_v48, %v1143_v51  ;;  %v1256_v51 = vperm.slane %v3013_v21, 3 }
 0x659   : > { %v1118_v57 = vsel %vm667_vm5, %v1117_v53, %v1088_v49  ;;  %v1155_v58 = vrot.slane %v1147_v55, 1  ;;  %v1167_v59 = vrot.slane %v1147_v55, 7  ;;  %1177 = vrot.lane.b32.xlu1 %v1147_v55, %s2612_s27 }
 0x65a   : > { %v1119_v60 = vsel %vm669_vm6, %v1118_v57, %v1086_v8 }
 0x65b   : > { %v1120_v61 = vsel %vm671_vm7, %v1119_v60, %v1093_v54  ;;  %v1168_v62 = vsel %vm659_vm1, %v1166_v43, %v1167_v59  ;;  %v1156_v63 = vsel %vm671_vm7, %v1154_v56, %v1155_v58 }
 0x65c   : > { %v1131_v0 = vmul.f32 %v3018_v25, %v1120_v61  ;;  %1190 = vrot.lane.b32.xlu2 %v1168_v62, %s2610_s15 }
 0x65d   : > { %v1108_v15 = vpop.permute.xlu0 %1107 }
 0x65e   : > { %v3065_v1 = vadd.f32 %v3022_v28, %v1131_v0  ;;  %v1098_v3 = vpop.permute.xlu1 %1097 }
 0x65f   : > { %v1121_v4 = vsel %vm659_vm1, %v1091_v9, %v1098_v3 }
 0x660   : > { %v1122_v7 = vsel %vm661_vm2, %v1121_v4, %v1096_v13  ;;  %vm1140_vm10 = vcmp.ge.f32.partialorder %v3065_v1, 0.0  ;;  %v1144_v8 = vmul.f32 0.02, %v3065_v1 }
 0x661   : > { %v1123_v10 = vsel %vm663_vm3, %v1122_v7, %v1103_v6  ;;  %vm1200_vm3 = vcmask 64512  }
 0x662   : > { %v1124_v14 = vsel %vm665_vm4, %v1123_v10, %v1101_v11  ;;  %v1148_v17 = vsel %vm1140_vm10, %v3065_v1, %v1144_v8  ;;  %vm1209_vm4 = vcmask 195584  }
 0x663   : > { %v1125_v9 = vsel %vm667_vm5, %v1124_v14, %v1108_v15  ;;  %1179 = vrot.lane.b32.xlu0 %v1148_v17, %s2612_s27  ;;  %v1157_v18 = vrot.slane %v1148_v17, 1  ;;  %v1169_v19 = vrot.slane %v1148_v17, 7 }
 0x664   : > { %v1126_v23 = vsel %vm669_vm6, %v1125_v9, %v1106_v12 }
 0x665   : > { %v1170_v13 = vsel %vm659_vm1, %v1167_v59, %v1169_v19  ;;  %v1158_v20 = vsel %vm671_vm7, %v1155_v58, %v1157_v18 }
 0x666   : > { %v1112_v22 = vpop.permute.xlu1 %1111  ;;  %1192 = vrot.lane.b32.xlu1 %v1170_v13, %s2610_s15 }
 0x667   : > { %v1127_v11 = vsel %vm671_vm7, %v1126_v23, %v1112_v22 }
 0x668   : > { %v1132_v24 = vmul.f32 %v3018_v25, %v1127_v11  ;;  %v952_v25 = vld [vmem:[#allocation13 + $0x10] sm:$0xff] }
 0x669   : > { %1235 = vmatpush.msrb.mxu3 %v952_v25  ;;  %v953_v25 = vld [vmem:[#allocation13 + $0x18] sm:$0xff] }
 0x66a   : > { %v3091_v26 = vadd.f32 %v3022_v28, %v1132_v24  ;;  %v951_v28 = vld [vmem:[#allocation13 + $0x8] sm:$0xff] }
 0x66b   : > { %1236 = vmatpush.msrb.mxu3 %v951_v28 }
 0x66c   : > { %vm1141_vm2 = vcmp.ge.f32.partialorder %v3091_v26, 0.0  ;;  %v1145_v27 = vmul.f32 0.02, %v3091_v26 }
 0x66d   : > { %1237 = vmatpush.msrb.mxu3 %v950_v33 }
 0x66e   : > { %v1149_v29 = vsel %vm1141_vm2, %v3091_v26, %v1145_v27 }
 0x66f   : > { %1181 = vrot.lane.b32.xlu2 %v1149_v29, %s2612_s27  ;;  %v1159_v5 = vrot.slane %v1149_v29, 1  ;;  %v1171_v30 = vrot.slane %v1149_v29, 7 }
 0x671   : > { %v1172_v12 = vsel %vm659_vm1, %v1169_v19, %v1171_v30  ;;  %v1160_v31 = vsel %vm671_vm7, %v1157_v18, %v1159_v5  ;;  %v1165_v46 = vsel %vm671_vm7, %v1159_v5, 0.0 }
 0x672   : > { %1194 = vrot.lane.b32.xlu0 %v1172_v12, %s2610_s15  ;;  %v955_v12 = vld [vmem:[#allocation13 + $0x28] sm:$0xff] }
 0x673   : > { %1356 = vmatpush.msrb.mxu2 %v955_v12  ;;  %v1399_v12 = vld [vmem:[#allocation15] sm:$0xff] }
 0x6a9   : > { %v1176_v34 = vpop.permute.xlu2 %1175 }
 0x6aa   : > { %v1201_v36 = vsel %vm1200_vm3, %v1156_v63, %v1176_v34 }
 0x6b6   : > { %v1191_v40 = vpop.permute.xlu2 %1190 }
 0x6c4   : > { %v1189_v37 = vpop.permute.xlu0 %1188 }
 0x6c5   : > { %v1205_v38 = vsel %vm830_vm12, %v1201_v36, %v1189_v37 }
 0x6c6   : > { %2050 = vmatmul.msk.f32.vlgmr.msrb.gmra.mxu3 %vm1209_vm4, %v1205_v38 }
 0x6c9   : > { %v1182_v45 = vpop.permute.xlu2 %1181 }
 0x6ca   : > { %v1204_v47 = vsel %vm1200_vm3, %v1165_v46, %v1182_v45 }
 0x6cb   : > { %v1178_v39 = vpop.permute.xlu1 %1177 }
 0x6cc   : > { %v1202_v2 = vsel %vm1200_vm3, %v1158_v20, %v1178_v39 }
 0x6cd   : > { %v1206_v41 = vsel %vm830_vm12, %v1202_v2, %v1191_v40 }
 0x6ce   : > { %2051 = vmatmul.msk.f32.gmra.mxu3 %vm1209_vm4, %v1206_v41 }
 0x6d5   : > { %v1180_v42 = vpop.permute.xlu0 %1179 }
 0x6d6   : > { %v1203_v43 = vsel %vm1200_vm3, %v1160_v31, %v1180_v42  ;;  %v954_v31 = vld [vmem:[#allocation13 + $0x20] sm:$0xff] }
 0x6d7   : > { %1357 = vmatpush.msrb.mxu2 %v954_v31 }
 0x6d8   : > { %v1193_v16 = vpop.permute.xlu1 %1192 }
 0x6d9   : > { %v1207_v44 = vsel %vm830_vm12, %v1203_v43, %v1193_v16  ;;  %1358 = vmatpush.msrb.mxu2 %v953_v25 }
 0x6da   : > { %2052 = vmatmul.msk.f32.gmra.mxu3 %vm1209_vm4, %v1207_v44 }
 0x6e4   : > { %v1195_v49 = vpop.permute.xlu0 %1194 }
 0x6e5   : > { %v1208_v32 = vsel %vm830_vm12, %v1204_v47, %v1195_v49  ;;  %v1372_v49 = vperm.slane %v3013_v21, 4 }
 0x6e6   : > { %2053 = vmatmul.msk.f32.gmra.mxu3 %vm1209_vm4, %v1208_v32  ;;  %v1377_v32 = vperm.slane %v3013_v21, 5 }
 0x749   : > { %v1239_v52 = vpop.f32.mrf.mxu3 }
 0x74a   : > { %v1252_v53 = vmul.f32 %v1251_v50, %v1239_v52 }
 0x74c   : > { %v1257_v54 = vadd.f32 %v1256_v51, %v1252_v53 }
 0x74e   : > { %vm1261_vm5 = vcmp.ge.f32.partialorder %v1257_v54, 0.0  ;;  %v1265_v55 = vmul.f32 0.02, %v1257_v54 }
 0x750   : > { %v1269_v56 = vsel %vm1261_vm5, %v1257_v54, %v1265_v55 }
 0x751   : > { %1298 = vrot.lane.b32.xlu1 %v1269_v56, %s2612_s27  ;;  %v1242_v57 = vpop.f32.mrf.mxu3  ;;  %v1289_v58 = vrot.slane %v1269_v56, 7  ;;  %v1277_v0 = vrot.slane %v1269_v56, 1 }
 0x752   : > { %v1253_v59 = vmul.f32 %v1251_v50, %v1242_v57 }
 0x753   : > { %v1297_v60 = vsel %vm659_vm1, 0.0, %v1289_v58 }
 0x754   : > { %v1258_v61 = vadd.f32 %v1256_v51, %v1253_v59  ;;  %1311 = vrot.lane.b32.xlu2 %v1297_v60, %s2610_s15 }
 0x756   : > { %vm1262_vm6 = vcmp.ge.f32.partialorder %v1258_v61, 0.0  ;;  %v1266_v62 = vmul.f32 0.02, %v1258_v61 }
 0x758   : > { %v1270_v63 = vsel %vm1262_vm6, %v1258_v61, %v1266_v62 }
 0x759   : > { %1300 = vrot.lane.b32.xlu0 %v1270_v63, %s2612_s27  ;;  %v1278_v3 = vrot.slane %v1270_v63, 1  ;;  %v1290_v4 = vrot.slane %v1270_v63, 7 }
 0x75b   : > { %v1291_v6 = vsel %vm659_vm1, %v1289_v58, %v1290_v4  ;;  %v1279_v7 = vsel %vm671_vm7, %v1277_v0, %v1278_v3 }
 0x75c   : > { %1313 = vrot.lane.b32.xlu1 %v1291_v6, %s2610_s15 }
 0x75d   : > { %v1245_v8 = vpop.f32.mrf.mxu3 }
 0x75e   : > { %v1254_v10 = vmul.f32 %v1251_v50, %v1245_v8 }
 0x760   : > { %v1259_v14 = vadd.f32 %v1256_v51, %v1254_v10 }
 0x762   : > { %vm1263_vm11 = vcmp.ge.f32.partialorder %v1259_v14, 0.0  ;;  %v1267_v15 = vmul.f32 0.02, %v1259_v14 }
 0x764   : > { %v1271_v17 = vsel %vm1263_vm11, %v1259_v14, %v1267_v15 }
 0x765   : > { %1302 = vrot.lane.b32.xlu2 %v1271_v17, %s2612_s27  ;;  %v1280_v9 = vrot.slane %v1271_v17, 1  ;;  %v1292_v18 = vrot.slane %v1271_v17, 7 }
 0x767   : > { %v1293_v19 = vsel %vm659_vm1, %v1290_v4, %v1292_v18  ;;  %v1281_v13 = vsel %vm671_vm7, %v1278_v3, %v1280_v9 }
 0x768   : > { %1315 = vrot.lane.b32.xlu0 %v1293_v19, %s2610_s15 }
 0x769   : > { %v1248_v20 = vpop.f32.mrf.mxu3 }
 0x76a   : > { %v1255_v22 = vmul.f32 %v1251_v50, %v1248_v20 }
 0x76c   : > { %v1260_v23 = vadd.f32 %v1256_v51, %v1255_v22 }
 0x76e   : > { %vm1264_vm14 = vcmp.ge.f32.partialorder %v1260_v23, 0.0  ;;  %v1268_v11 = vmul.f32 0.02, %v1260_v23 }
 0x770   : > { %v1272_v24 = vsel %vm1264_vm14, %v1260_v23, %v1268_v11 }
 0x771   : > { %1304 = vrot.lane.b32.xlu1 %v1272_v24, %s2612_s27  ;;  %v1282_v27 = vrot.slane %v1272_v24, 1  ;;  %v1294_v29 = vrot.slane %v1272_v24, 7 }
 0x773   : > { %v1295_v5 = vsel %vm659_vm1, %v1292_v18, %v1294_v29  ;;  %v1283_v30 = vsel %vm671_vm7, %v1280_v9, %v1282_v27  ;;  %v1288_v44 = vsel %vm671_vm7, %v1282_v27, 0.0 }
 0x774   : > { %1317 = vrot.lane.b32.xlu2 %v1295_v5, %s2610_s15  ;;  %v1401_v5 = vld [vmem:[#allocation15 + $0x10] sm:$0xff] }
 0x775   : > { %1485 = vmatpush.msra.mxu0 %v1401_v5 }
 0x7ae   : > { %v1312_v33 = vpop.permute.xlu2 %1311 }
 0x7bf   : > { %v1303_v2 = vpop.permute.xlu2 %1302 }
 0x7c0   : > { %v1325_v41 = vsel %vm1200_vm3, %v1283_v30, %v1303_v2  ;;  %v1400_v30 = vld [vmem:[#allocation15 + $0x8] sm:$0xff] }
 0x7c1   : > { %1486 = vmatpush.msra.mxu0 %v1400_v30 }
 0x7c3   : > { %v1299_v28 = vpop.permute.xlu1 %1298  ;;  %1487 = vmatpush.msra.mxu0 %v1399_v12 }
 0x7c4   : > { %v1323_v34 = vsel %vm1200_vm3, %v1279_v7, %v1299_v28 }
 0x7c5   : > { %v1327_v36 = vsel %vm830_vm12, %v1323_v34, %v1312_v33 }
 0x7c6   : > { %2054 = vmatmul.msk.f32.vlgmr.msrb.gmra.mxu2 %vm1209_vm4, %v1327_v36 }
 0x7cb   : > { %v1301_v37 = vpop.permute.xlu0 %1300 }
 0x7cc   : > { %v1324_v38 = vsel %vm1200_vm3, %v1281_v13, %v1301_v37 }
 0x7ce   : > { %v1314_v39 = vpop.permute.xlu1 %1313  ;;  %v1318_v45 = vpop.permute.xlu2 %1317 }
 0x7cf   : > { %v1328_v40 = vsel %vm830_vm12, %v1324_v38, %v1314_v39 }
 0x7d0   : > { %2055 = vmatmul.msk.f32.gmra.mxu2 %vm1209_vm4, %v1328_v40 }
 0x7da   : > { %v1316_v42 = vpop.permute.xlu0 %1315 }
 0x7db   : > { %v1329_v43 = vsel %vm830_vm12, %v1325_v41, %v1316_v42 }
 0x7dc   : > { %2056 = vmatmul.msk.f32.gmra.mxu2 %vm1209_vm4, %v1329_v43 }
 0x7e3   : > { %v1305_v16 = vpop.permute.xlu1 %1304 }
 0x7e4   : > { %v1326_v46 = vsel %vm1200_vm3, %v1288_v44, %v1305_v16 }
 0x7e5   : > { %v1330_v47 = vsel %vm830_vm12, %v1326_v46, %v1318_v45  ;;  %v1398_v45 = vld [vmem:[%s3324_s13] sm:$0x3] }
 0x7e6   : > { %2057 = vmatmul.msk.f32.gmra.mxu2 %vm1209_vm4, %v1330_v47  ;;  %v1501_v46 = vperm.slane %v1398_v45, 0  ;;  %v1506_v47 = vperm.slane %v1398_v45, 1 }
 0x849   : > { %v1360_v50 = vpop.f32.mrf.mxu2 }
 0x84a   : > { %v1373_v51 = vmul.f32 %v1372_v49, %v1360_v50 }
 0x84c   : > { %v1378_v52 = vadd.f32 %v1377_v32, %v1373_v51 }
 0x84e   : > { %v1382_v53 = vadd.f32 %v1378_v52, %v3029_v35 }
 0x850   : > { %vm1386_vm15 = vcmp.ge.f32.partialorder %v1382_v53, 0.0  ;;  %v1390_v54 = vmul.f32 0.02, %v1382_v53 }
 0x852   : > { %v1394_v55 = vsel %vm1386_vm15, %v1382_v53, %v1390_v54 }
 0x853   : > { %1427 = vrot.lane.b32.xlu0 %v1394_v55, %s2612_s27  ;;  %v1363_v56 = vpop.f32.mrf.mxu2  ;;  %v1418_v57 = vrot.slane %v1394_v55, 7  ;;  %v1406_v63 = vrot.slane %v1394_v55, 1 }
 0x854   : > { %v1374_v58 = vmul.f32 %v1372_v49, %v1363_v56 }
 0x855   : > { %v1426_v59 = vsel %vm659_vm1, 0.0, %v1418_v57 }
 0x856   : > { %v1379_v60 = vadd.f32 %v1377_v32, %v1374_v58  ;;  %1440 = vrot.lane.b32.xlu1 %v1426_v59, %s2610_s15 }
 0x858   : > { %v1383_v21 = vadd.f32 %v1379_v60, %v3046_v48 }
 0x85a   : > { %vm1387_vm10 = vcmp.ge.f32.partialorder %v1383_v21, 0.0  ;;  %v1391_v61 = vmul.f32 0.02, %v1383_v21 }
 0x85c   : > { %v1395_v62 = vsel %vm1387_vm10, %v1383_v21, %v1391_v61 }
 0x85d   : > { %1429 = vrot.lane.b32.xlu2 %v1395_v62, %s2612_s27  ;;  %v1407_v35 = vrot.slane %v1395_v62, 1  ;;  %v1419_v0 = vrot.slane %v1395_v62, 7 }
 0x85f   : > { %v1366_v3 = vpop.f32.mrf.mxu2  ;;  %v1420_v4 = vsel %vm659_vm1, %v1418_v57, %v1419_v0  ;;  %v1408_v6 = vsel %vm671_vm7, %v1406_v63, %v1407_v35 }
 0x860   : > { %v1375_v7 = vmul.f32 %v1372_v49, %v1366_v3  ;;  %1442 = vrot.lane.b32.xlu0 %v1420_v4, %s2610_s15 }
 0x862   : > { %v1380_v8 = vadd.f32 %v1377_v32, %v1375_v7 }
 0x864   : > { %v1384_v10 = vadd.f32 %v1380_v8, %v3065_v1 }
 0x866   : > { %vm1388_vm2 = vcmp.ge.f32.partialorder %v1384_v10, 0.0  ;;  %v1392_v48 = vmul.f32 0.02, %v1384_v10 }
 0x868   : > { %v1396_v14 = vsel %vm1388_vm2, %v1384_v10, %v1392_v48 }
 0x869   : > { %1431 = vrot.lane.b32.xlu1 %v1396_v14, %s2612_s27  ;;  %v1409_v15 = vrot.slane %v1396_v14, 1  ;;  %v1421_v17 = vrot.slane %v1396_v14, 7  ;;  %v1369_v9 = vpop.f32.mrf.mxu2 }
 0x86a   : > { %v1376_v18 = vmul.f32 %v1372_v49, %v1369_v9 }
 0x86b   : > { %v1422_v19 = vsel %vm659_vm1, %v1419_v0, %v1421_v17  ;;  %v1410_v13 = vsel %vm671_vm7, %v1407_v35, %v1409_v15 }
 0x86c   : > { %v1381_v20 = vadd.f32 %v1377_v32, %v1376_v18  ;;  %1444 = vrot.lane.b32.xlu2 %v1422_v19, %s2610_s15 }
 0x86e   : > { %v1385_v22 = vadd.f32 %v1381_v20, %v3091_v26 }
 0x870   : > { %vm1389_vm5 = vcmp.ge.f32.partialorder %v1385_v22, 0.0  ;;  %v1393_v1 = vmul.f32 0.02, %v1385_v22 }
 0x872   : > { %v1397_v23 = vsel %vm1389_vm5, %v1385_v22, %v1393_v1  ;;  %v1525_v1 = vld [vmem:[#allocation16 + $0x10] sm:$0xff] }
 0x873   : > { %1433 = vrot.lane.b32.xlu0 %v1397_v23, %s2612_s27  ;;  %v1411_v11 = vrot.slane %v1397_v23, 1  ;;  %v1423_v24 = vrot.slane %v1397_v23, 7  ;;  %1609 = vmatpush.msra.mxu1 %v1525_v1  ;;  %v1524_v23 = vld [vmem:[#allocation16 + $0x8] sm:$0xff] }
 0x875   : > { %v1424_v27 = vsel %vm659_vm1, %v1421_v17, %v1423_v24  ;;  %v1412_v29 = vsel %vm671_vm7, %v1409_v15, %v1411_v11  ;;  %v1417_v42 = vsel %vm671_vm7, %v1411_v11, 0.0  ;;  %v1523_v11 = vld [vmem:[#allocation16] sm:$0xff]  ;;  %1610 = vmatpush.msra.mxu1 %v1524_v23 }
 0x876   : > { %1446 = vrot.lane.b32.xlu1 %v1424_v27, %s2610_s15 }
 0x877   : > { %1611 = vmatpush.msra.mxu1 %v1523_v11 }
 0x8b7   : > { %v1430_v33 = vpop.permute.xlu2 %1429 }
 0x8b8   : > { %v1453_v34 = vsel %vm1200_vm3, %v1410_v13, %v1430_v33 }
 0x8c5   : > { %v1428_v26 = vpop.permute.xlu0 %1427 }
 0x8c6   : > { %v1452_v31 = vsel %vm1200_vm3, %v1408_v6, %v1428_v26  ;;  %v1445_v39 = vpop.permute.xlu2 %1444 }
 0x8c8   : > { %v1441_v25 = vpop.permute.xlu1 %1440 }
 0x8c9   : > { %v1456_v28 = vsel %vm830_vm12, %v1452_v31, %v1441_v25 }
 0x8ca   : > { %2058 = vmatmul.msk.f32.vlgmr.msra.gmra.mxu0 %vm1209_vm4, %v1456_v28 }
 0x8d2   : > { %v1443_v36 = vpop.permute.xlu0 %1442 }
 0x8d3   : > { %v1457_v37 = vsel %vm830_vm12, %v1453_v34, %v1443_v36 }
 0x8d4   : > { %2059 = vmatmul.msk.f32.gmra.mxu0 %vm1209_vm4, %v1457_v37 }
 0x8db   : > { %v1432_v38 = vpop.permute.xlu1 %1431 }
 0x8dc   : > { %v1454_v40 = vsel %vm1200_vm3, %v1412_v29, %v1432_v38 }
 0x8dd   : > { %v1458_v2 = vsel %vm830_vm12, %v1454_v40, %v1445_v39 }
 0x8de   : > { %2060 = vmatmul.msk.f32.gmra.mxu0 %vm1209_vm4, %v1458_v2 }
 0x8e5   : > { %v1434_v41 = vpop.permute.xlu0 %1433 }
 0x8e6   : > { %v1455_v43 = vsel %vm1200_vm3, %v1417_v42, %v1434_v41 }
 0x8e8   : > { %v1447_v16 = vpop.permute.xlu1 %1446 }
 0x8e9   : > { %v1459_v44 = vsel %vm830_vm12, %v1455_v43, %v1447_v16 }
 0x8ea   : > { %2061 = vmatmul.msk.f32.gmra.mxu0 %vm1209_vm4, %v1459_v44 }
 0x947   : > { %v1489_v49 = vpop.f32.mrf.mxu0 }
 0x948   : > { %v1502_v32 = vmul.f32 %v1501_v46, %v1489_v49 }
 0x94a   : > { %v1507_v50 = vadd.f32 %v1506_v47, %v1502_v32 }
 0x94c   : > { %vm1511_vm6 = vcmp.ge.f32.partialorder %v1507_v50, 0.0  ;;  %v1515_v51 = vmul.f32 0.02, %v1507_v50 }
 0x94e   : > { %v1519_v52 = vsel %vm1511_vm6, %v1507_v50, %v1515_v51 }
 0x94f   : > { %1551 = vrot.lane.b32.xlu2 %v1519_v52, %s2612_s27  ;;  %v1542_v53 = vrot.slane %v1519_v52, 7  ;;  %v1530_v60 = vrot.slane %v1519_v52, 1 }
 0x951   : > { %v1492_v54 = vpop.f32.mrf.mxu0  ;;  %v1550_v55 = vsel %vm659_vm1, 0.0, %v1542_v53 }
 0x952   : > { %v1503_v56 = vmul.f32 %v1501_v46, %v1492_v54  ;;  %1564 = vrot.lane.b32.xlu0 %v1550_v55, %s2610_s15 }
 0x954   : > { %v1508_v57 = vadd.f32 %v1506_v47, %v1503_v56 }
 0x956   : > { %vm1512_vm11 = vcmp.ge.f32.partialorder %v1508_v57, 0.0  ;;  %v1516_v58 = vmul.f32 0.02, %v1508_v57 }
 0x958   : > { %v1520_v59 = vsel %vm1512_vm11, %v1508_v57, %v1516_v58 }
 0x959   : > { %1553 = vrot.lane.b32.xlu1 %v1520_v59, %s2612_s27  ;;  %v1531_v21 = vrot.slane %v1520_v59, 1  ;;  %v1543_v61 = vrot.slane %v1520_v59, 7 }
 0x95b   : > { %v1495_v62 = vpop.f32.mrf.mxu0  ;;  %v1544_v63 = vsel %vm659_vm1, %v1542_v53, %v1543_v61  ;;  %v1532_v35 = vsel %vm671_vm7, %v1530_v60, %v1531_v21 }
 0x95c   : > { %v1504_v0 = vmul.f32 %v1501_v46, %v1495_v62  ;;  %1566 = vrot.lane.b32.xlu2 %v1544_v63, %s2610_s15 }
 0x95e   : > { %v1509_v3 = vadd.f32 %v1506_v47, %v1504_v0 }
 0x960   : > { %vm1513_vm14 = vcmp.ge.f32.partialorder %v1509_v3, 0.0  ;;  %v1517_v4 = vmul.f32 0.02, %v1509_v3 }
 0x962   : > { %v1521_v6 = vsel %vm1513_vm14, %v1509_v3, %v1517_v4 }
 0x963   : > { %1555 = vrot.lane.b32.xlu0 %v1521_v6, %s2612_s27  ;;  %v1533_v7 = vrot.slane %v1521_v6, 1  ;;  %v1545_v8 = vrot.slane %v1521_v6, 7 }
 0x965   : > { %v1546_v10 = vsel %vm659_vm1, %v1543_v61, %v1545_v8  ;;  %v1534_v48 = vsel %vm671_vm7, %v1531_v21, %v1533_v7 }
 0x966   : > { %1568 = vrot.lane.b32.xlu1 %v1546_v10, %s2610_s15 }
 0x967   : > { %v1498_v14 = vpop.f32.mrf.mxu0 }
 0x968   : > { %v1505_v15 = vmul.f32 %v1501_v46, %v1498_v14 }
 0x96a   : > { %v1510_v17 = vadd.f32 %v1506_v47, %v1505_v15 }
 0x96c   : > { %vm1514_vm15 = vcmp.ge.f32.partialorder %v1510_v17, 0.0  ;;  %v1518_v9 = vmul.f32 0.02, %v1510_v17 }
 0x96e   : > { %v1522_v18 = vsel %vm1514_vm15, %v1510_v17, %v1518_v9 }
 0x96f   : > { %1557 = vrot.lane.b32.xlu2 %v1522_v18, %s2612_s27  ;;  %v1535_v19 = vrot.slane %v1522_v18, 1  ;;  %v1547_v13 = vrot.slane %v1522_v18, 7 }
 0x971   : > { %v1548_v20 = vsel %vm659_vm1, %v1545_v8, %v1547_v13  ;;  %v1536_v22 = vsel %vm671_vm7, %v1533_v7, %v1535_v19  ;;  %v1541_v37 = vsel %vm671_vm7, %v1535_v19, 0.0 }
 0x972   : > { %1570 = vrot.lane.b32.xlu0 %v1548_v20, %s2610_s15 }
 0x9a9   : > { %v1552_v24 = vpop.permute.xlu2 %1551 }
 0x9aa   : > { %v1576_v27 = vsel %vm1200_vm3, %v1532_v35, %v1552_v24 }
 0x9b6   : > { %v1567_v12 = vpop.permute.xlu2 %1566 }
 0x9c4   : > { %v1565_v29 = vpop.permute.xlu0 %1564 }
 0x9c5   : > { %v1580_v5 = vsel %vm830_vm12, %v1576_v27, %v1565_v29 }
 0x9c6   : > { %2062 = vmatmul.msk.f32.vlgmr.msra.gmra.mxu1 %vm1209_vm4, %v1580_v5 }
 0x9c9   : > { %v1558_v36 = vpop.permute.xlu2 %1557 }
 0x9ca   : > { %v1579_v38 = vsel %vm1200_vm3, %v1541_v37, %v1558_v36 }
 0x9cb   : > { %v1554_v30 = vpop.permute.xlu1 %1553 }
 0x9cc   : > { %v1577_v26 = vsel %vm1200_vm3, %v1534_v48, %v1554_v30 }
 0x9cd   : > { %v1581_v31 = vsel %vm830_vm12, %v1577_v26, %v1567_v12 }
 0x9ce   : > { %2063 = vmatmul.msk.f32.gmra.mxu1 %vm1209_vm4, %v1581_v31 }
 0x9d5   : > { %v1556_v25 = vpop.permute.xlu0 %1555 }
 0x9d6   : > { %v1578_v28 = vsel %vm1200_vm3, %v1536_v22, %v1556_v25 }
 0x9d8   : > { %v1569_v33 = vpop.permute.xlu1 %1568 }
 0x9d9   : > { %v1582_v34 = vsel %vm830_vm12, %v1578_v28, %v1569_v33 }
 0x9da   : > { %2064 = vmatmul.msk.f32.gmra.mxu1 %vm1209_vm4, %v1582_v34 }
 0x9e4   : > { %v1571_v39 = vpop.permute.xlu0 %1570 }
 0x9e5   : > { %v1583_v40 = vsel %vm830_vm12, %v1579_v38, %v1571_v39 }
 0x9e6   : > { %2065 = vmatmul.msk.f32.gmra.mxu1 %vm1209_vm4, %v1583_v40 }
 0xa43   : > { %v1613_v2 = vpop.f32.mrf.mxu1 }
 0xa44   : > { %v2066_v41 = vmul.f32 -1.442695, %v1613_v2 }
 0xa46   : > { %2221 = vpow2.f32 %v2066_v41 }
 0xa4b   : > { %v1616_v42 = vpop.f32.mrf.mxu1 }
 0xa4c   : > { %v2222_v43 = vpop.eup %2221  ;;  %v2067_v16 = vmul.f32 -1.442695, %v1616_v42 }
 0xa4d   : > { %v1637_v44 = vadd.f32 1.0, %v2222_v43 }
 0xa4e   : > { %2223 = vpow2.f32 %v2067_v16 }
 0xa4f   : > { %2225 = vrcp.f32 %v1637_v44  ;;  %v1652_v52 = vand.u32 2147483648, %v1637_v44  ;;  %v1650_v54 = vand.u32 2147483647, %v1637_v44  ;;  %vm1646_vm10 = vweird.f32 %v1637_v44 }
 0xa51   : > { %v1653_v57 = vor.u32 1.1754944e-38, %v1652_v52  ;;  %vm1651_vm5 = vcmp.eq.f32.partialorder %v1650_v54, 8.507059e+37 }
 0xa54   : > { %v2224_v45 = vpop.eup %2223 }
 0xa55   : > { %v2226_v46 = vpop.eup %2225  ;;  %v1638_v47 = vadd.f32 1.0, %v2224_v45 }
 0xa56   : > { %v1642_v49 = vmul.f32 %v2226_v46, %v1637_v44  ;;  %vm1647_vm7 = vweird.f32 %v2226_v46 }
 0xa57   : > { %2227 = vrcp.f32 %v1638_v47  ;;  %v1619_v32 = vpop.f32.mrf.mxu1  ;;  %vm1648_vm2 = vmor %vm1646_vm10, %vm1647_vm7  ;;  %v1667_v8 = vand.u32 2147483648, %v1638_v47  ;;  %vm1661_vm11 = vweird.f32 %v1638_v47  ;;  %v1665_v10 = vand.u32 2147483647, %v1638_v47 }
 0xa58   : > { %v1643_v50 = vsub.f32 1.0, %v1642_v49  ;;  %v2068_v51 = vmul.f32 -1.442695, %v1619_v32 }
 0xa59   : > { %v1668_v19 = vor.u32 1.1754944e-38, %v1667_v8  ;;  %vm1666_vm15 = vcmp.eq.f32.partialorder %v1665_v10, 8.507059e+37 }
 0xa5a   : > { %v1644_v53 = vmul.f32 %v2226_v46, %v1643_v50  ;;  %2229 = vpow2.f32 %v2068_v51 }
 0xa5c   : > { %v1645_v55 = vadd.f32 %v2226_v46, %v1644_v53 }
 0xa5d   : > { %v2228_v56 = vpop.eup %2227 }
 0xa5e   : > { %v1649_v58 = vsel %vm1648_vm2, %v2226_v46, %v1645_v55  ;;  %v1657_v59 = vmul.f32 %v2228_v56, %v1638_v47  ;;  %vm1662_vm6 = vweird.f32 %v2228_v56 }
 0xa5f   : > { %v3208_v60 = vsel %vm1651_vm5, %v1653_v57, %v1649_v58  ;;  %vm1663_vm14 = vmor %vm1661_vm11, %vm1662_vm6 }
 0xa60   : > { %v2230_v21 = vpop.eup %2229  ;;  %v1658_v61 = vsub.f32 1.0, %v1657_v59  ;;  %v1710_v62 = vrot.slane %v3208_v60, 3  ;;  %v1706_v63 = vrot.slane %v3208_v60, 2  ;;  %v1702_v35 = vrot.slane %v3208_v60, 1 }
 0xa61   : > { %v1639_v0 = vadd.f32 1.0, %v2230_v21  ;;  %v1722_v48 = vrot.slane %v3208_v60, 6  ;;  %v1718_v14 = vrot.slane %v3208_v60, 5  ;;  %v1714_v17 = vrot.slane %v3208_v60, 4 }
 0xa62   : > { %v1659_v3 = vmul.f32 %v2228_v56, %v1658_v61  ;;  %1711 = vrot.lane.b32.xlu0 %v1710_v62, %s2613_s25  ;;  %1707 = vrot.lane.b32.xlu2 %v1706_v63, %s2610_s15  ;;  %v1726_v11 = vrot.slane %v3208_v60, 7 }
 0xa63   : > { %2231 = vrcp.f32 %v1639_v0  ;;  %1703 = vrot.lane.b32.xlu1 %v1702_v35, %s2612_s27  ;;  %v1622_v4 = vpop.f32.mrf.mxu1  ;;  %v1682_v5 = vand.u32 2147483648, %v1639_v0  ;;  %vm1676_vm10 = vweird.f32 %v1639_v0  ;;  %v1680_v30 = vand.u32 2147483647, %v1639_v0 }
 0xa64   : > { %v2069_v6 = vmul.f32 -1.442695, %v1622_v4  ;;  %v1660_v7 = vadd.f32 %v2228_v56, %v1659_v3 }
 0xa65   : > { %v1683_v33 = vor.u32 1.1754944e-38, %v1682_v5  ;;  %vm1681_vm5 = vcmp.eq.f32.partialorder %v1680_v30, 8.507059e+37 }
 0xa66   : > { %2233 = vpow2.f32 %v2069_v6  ;;  %v1664_v18 = vsel %vm1663_vm14, %v2228_v56, %v1660_v7 }
 0xa67   : > { %v3222_v22 = vsel %vm1666_vm15, %v1668_v19, %v1664_v18 }
 0xa68   : > { %v1734_v23 = vrot.slane %v3222_v22, 1  ;;  %v1742_v12 = vrot.slane %v3222_v22, 3  ;;  %v1750_v26 = vrot.slane %v3222_v22, 5  ;;  %v1738_v31 = vrot.slane %v3222_v22, 2 }
 0xa69   : > { %v2232_v15 = vpop.eup %2231  ;;  %v1746_v39 = vrot.slane %v3222_v22, 4  ;;  %v1758_v56 = vrot.slane %v3222_v22, 7  ;;  %v1754_v57 = vrot.slane %v3222_v22, 6 }
 0xa6a   : > { %v1672_v9 = vmul.f32 %v2232_v15, %v1639_v0  ;;  %1723 = vrot.lane.b32.xlu0 %v1722_v48, %s2614_s26  ;;  %1719 = vrot.lane.b32.xlu2 %v1718_v14, %s2615_s17  ;;  %vm1677_vm7 = vweird.f32 %v2232_v15 }
 0xa6b   : > { %1715 = vrot.lane.b32.xlu1 %v1714_v17, %s2606_s29  ;;  %vm1678_vm2 = vmor %vm1676_vm10, %vm1677_vm7  ;;  %vm1766_vm7 = vcmask 326656   ;;  %vm1783_vm10 = vcmask 982016  }
 0xa6c   : > { %v2234_v13 = vpop.eup %2233  ;;  %v1673_v1 = vsub.f32 1.0, %v1672_v9 }
 0xa6d   : > { %v1640_v20 = vadd.f32 1.0, %v2234_v13 }
 0xa6e   : > { %v1674_v24 = vmul.f32 %v2232_v15, %v1673_v1 }
 0xa6f   : > { %2235 = vrcp.f32 %v1640_v20  ;;  %v1697_v41 = vand.u32 2147483648, %v1640_v20  ;;  %vm1691_vm11 = vweird.f32 %v1640_v20  ;;  %v1695_v42 = vand.u32 2147483647, %v1640_v20 }
 0xa70   : > { %v1675_v27 = vadd.f32 %v2232_v15, %v1674_v24 }
 0xa71   : > { %v1698_v46 = vor.u32 1.1754944e-38, %v1697_v41  ;;  %vm1696_vm15 = vcmp.eq.f32.partialorder %v1695_v42, 8.507059e+37 }
 0xa72   : > { %1731 = vrot.lane.b32.xlu2 %v3222_v22, %s2608_s14  ;;  %1735 = vrot.lane.b32.xlu0 %v1734_v23, %s2616_s30  ;;  %v1679_v25 = vsel %vm1678_vm2, %v2232_v15, %v1675_v27 }
 0xa73   : > { %1727 = vrot.lane.b32.xlu1 %v1726_v11, %s2617_s12  ;;  %v3236_v34 = vsel %vm1681_vm5, %v1683_v33, %v1679_v25 }
 0xa74   : > { %v1794_v37 = vrot.slane %v3236_v34, 3  ;;  %v1786_v38 = vrot.slane %v3236_v34, 1  ;;  %v1806_v43 = vrot.slane %v3236_v34, 6  ;;  %v1798_v16 = vrot.slane %v3236_v34, 4 }
 0xa75   : > { %v2236_v29 = vpop.eup %2235  ;;  %v1790_v44 = vrot.slane %v3236_v34, 2  ;;  %v1810_v49 = vrot.slane %v3236_v34, 7  ;;  %v1802_v50 = vrot.slane %v3236_v34, 5 }
 0xa76   : > { %v1687_v28 = vmul.f32 %v2236_v29, %v1640_v20  ;;  %vm1692_vm6 = vweird.f32 %v2236_v29 }
 0xa77   : > { %vm1693_vm14 = vmor %vm1691_vm11, %vm1692_vm6 }
 0xa78   : > { %v1688_v36 = vsub.f32 1.0, %v1687_v28 }
 0xa7a   : > { %1743 = vrot.lane.b32.xlu2 %v1742_v12, %s2618_s10  ;;  %1751 = vrot.lane.b32.xlu0 %v1750_v26, %s2619_s18  ;;  %v1689_v40 = vmul.f32 %v2236_v29, %v1688_v36 }
 0xa7b   : > { %1739 = vrot.lane.b32.xlu1 %v1738_v31, %s2620_s24 }
 0xa7c   : > { %v1690_v2 = vadd.f32 %v2236_v29, %v1689_v40 }
 0xa7e   : > { %v1694_v45 = vsel %vm1693_vm14, %v2236_v29, %v1690_v2 }
 0xa7f   : > { %v1699_v47 = vsel %vm1696_vm15, %v1698_v46, %v1694_v45 }
 0xa80   : > { %v1818_v32 = vrot.slane %v1699_v47, 1  ;;  %v1822_v51 = vrot.slane %v1699_v47, 2  ;;  %v1830_v52 = vrot.slane %v1699_v47, 4  ;;  %v1834_v53 = vrot.slane %v1699_v47, 5 }
 0xa81   : > { %v1838_v54 = vrot.slane %v1699_v47, 6  ;;  %v1826_v55 = vrot.slane %v1699_v47, 3  ;;  %v1842_v58 = vrot.slane %v1699_v47, 7 }
 0xa82   : > { %1795 = vrot.lane.b32.xlu2 %v1794_v37, %s2613_s25  ;;  %1787 = vrot.lane.b32.xlu0 %v1786_v38, %s2612_s27 }
 0xa83   : > { %1747 = vrot.lane.b32.xlu1 %v1746_v39, %s2607_s19 }
 0xa8a   : > { %1807 = vrot.lane.b32.xlu2 %v1806_v43, %s2614_s26  ;;  %1799 = vrot.lane.b32.xlu0 %v1798_v16, %s2606_s29  ;;  %s2040_s29 = sshll.u32 %s3331_s28, 1 }
 0xa8b   : > { %1791 = vrot.lane.b32.xlu1 %v1790_v44, %s2610_s15 }
 0xa92   : > { %1811 = vrot.lane.b32.xlu0 %v1810_v49, %s2617_s12  ;;  %1819 = vrot.lane.b32.xlu2 %v1818_v32, %s2616_s30 }
 0xa93   : > { %1803 = vrot.lane.b32.xlu1 %v1802_v50, %s2615_s17 }
 0xa9a   : > { %1823 = vrot.lane.b32.xlu0 %v1822_v51, %s2620_s24  ;;  %1831 = vrot.lane.b32.xlu2 %v1830_v52, %s2607_s19 }
 0xa9b   : > { %1815 = vrot.lane.b32.xlu1 %v1699_v47, %s2608_s14  ;;  %v1866_v47 = vlaneseq }
 0xa9d   : > { %vm1868_vm2 = vcmp.lt.s32.totalorder %v1866_v47, 256 }
 0xaa2   : > { %1835 = vrot.lane.b32.xlu0 %v1834_v53, %s2619_s18  ;;  %1839 = vrot.lane.b32.xlu2 %v1838_v54, %s2609_s1 }
 0xaa3   : > { %1827 = vrot.lane.b32.xlu1 %v1826_v55, %s2618_s10 }
 0xaaa   : > { %1759 = vrot.lane.b32.xlu0 %v1758_v56, %s2611_s21  ;;  %1755 = vrot.lane.b32.xlu2 %v1754_v57, %s2609_s1  ;;  %s3325_s1 = sld [smem:[#allocation27_spill]] }
 0xaab   : > { %1843 = vrot.lane.b32.xlu1 %v1842_v58, %s2611_s21 }
 0xab0   : > { %s571_s15 = scalar_lea.vmem %s3325_s1, %s2040_s29 }
 0xabc   : > { %v1708_v59 = vpop.permute.xlu2 %1707 }
 0xac4   : > { %v1720_v21 = vpop.permute.xlu2 %1719 }
 0xacc   : > { %v1732_v63 = vpop.permute.xlu2 %1731 }
 0xad4   : > { %v1712_v61 = vpop.permute.xlu0 %1711  ;;  %v1744_v3 = vpop.permute.xlu2 %1743 }
 0xad5   : > { %v1704_v62 = vpop.permute.xlu1 %1703 }
 0xad6   : > { %v1762_v20 = vsel %vm1200_vm3, %v3208_v60, %v1704_v62 }
 0xad7   : > { %v1763_v23 = vsel %vm830_vm12, %v1762_v20, %v1708_v59 }
 0xad8   : > { %v1764_v27 = vsel %vm1209_vm4, %v1763_v23, %v1712_v61 }
 0xadc   : > { %v1724_v35 = vpop.permute.xlu0 %1723  ;;  %v1796_v7 = vpop.permute.xlu2 %1795 }
 0xadd   : > { %v1716_v0 = vpop.permute.xlu1 %1715 }
 0xade   : > { %v1765_v30 = vsel %vm587_vm0, %v1764_v27, %v1716_v0 }
 0xadf   : > { %v1767_v26 = vsel %vm1766_vm7, %v1765_v30, %v1720_v21 }
 0xae0   : > { %v1768_v28 = vsel %vm835_vm13, %v1767_v26, %v1724_v35 }
 0xae4   : > { %v1736_v4 = vpop.permute.xlu0 %1735  ;;  %v1808_v48 = vpop.permute.xlu2 %1807 }
 0xae5   : > { %v1728_v6 = vpop.permute.xlu1 %1727 }
 0xaec   : > { %v1752_v8 = vpop.permute.xlu0 %1751  ;;  %v1820_v18 = vpop.permute.xlu2 %1819 }
 0xaed   : > { %v1740_v10 = vpop.permute.xlu1 %1739 }
 0xaf4   : > { %v1788_v14 = vpop.permute.xlu0 %1787  ;;  %v1832_v29 = vpop.permute.xlu2 %1831 }
 0xaf5   : > { %v1748_v15 = vpop.permute.xlu1 %1747  ;;  %v1846_v19 = vsel %vm1200_vm3, %v3236_v34, %v1788_v14  ;;  %vm1769_vm3 = vcmask 457728  }
 0xaf6   : > { %v1770_v34 = vsel %vm1769_vm3, %v1768_v28, %v1728_v6 }
 0xaf7   : > { %v1771_v38 = vsel %vm713_vm8, %v1770_v34, %v1732_v63 }
 0xafc   : > { %v1800_v17 = vpop.permute.xlu0 %1799  ;;  %v1840_v36 = vpop.permute.xlu2 %1839 }
 0xafd   : > { %v1792_v9 = vpop.permute.xlu1 %1791 }
 0xafe   : > { %v1847_v13 = vsel %vm830_vm12, %v1846_v19, %v1792_v9  ;;  %vm1772_vm12 = vcmask 588800  }
 0xaff   : > { %v1848_v22 = vsel %vm1209_vm4, %v1847_v13, %v1796_v7  ;;  %vm1776_vm4 = vcmask 719872   ;;  %v1773_v41 = vsel %vm1772_vm12, %v1771_v38, %v1736_v4 }
 0xb00   : > { %v1849_v24 = vsel %vm587_vm0, %v1848_v22, %v1800_v17  ;;  %vm1774_vm0 = vcmask 654336  }
 0xb01   : > { %v1775_v43 = vsel %vm1774_vm0, %v1773_v41, %v1740_v10 }
 0xb02   : > { %v1777_v44 = vsel %vm1776_vm4, %v1775_v43, %v1744_v3 }
 0xb03   : > { %v1778_v46 = vsel %vm715_vm9, %v1777_v44, %v1748_v15 }
 0xb04   : > { %v1812_v1 = vpop.permute.xlu0 %1811  ;;  %v1756_v49 = vpop.permute.xlu2 %1755 }
 0xb05   : > { %v1804_v11 = vpop.permute.xlu1 %1803 }
 0xb06   : > { %v1850_v5 = vsel %vm1766_vm7, %v1849_v24, %v1804_v11 }
 0xb07   : > { %v1851_v12 = vsel %vm835_vm13, %v1850_v5, %v1808_v48  ;;  %vm1779_vm13 = vcmask 850944  }
 0xb08   : > { %v1852_v25 = vsel %vm1769_vm3, %v1851_v12, %v1812_v1  ;;  %v1780_v52 = vsel %vm1779_vm13, %v1778_v46, %v1752_v8 }
 0xb0c   : > { %v1824_v60 = vpop.permute.xlu0 %1823 }
 0xb0d   : > { %v1816_v31 = vpop.permute.xlu1 %1815 }
 0xb0e   : > { %v1853_v33 = vsel %vm713_vm8, %v1852_v25, %v1816_v31  ;;  %vm1781_vm8 = vcmask 916480  }
 0xb0f   : > { %v1854_v37 = vsel %vm1772_vm12, %v1853_v33, %v1820_v18  ;;  %v1782_v54 = vsel %vm1781_vm8, %v1780_v52, %v1756_v49 }
 0xb10   : > { %v1855_v40 = vsel %vm1774_vm0, %v1854_v37, %v1824_v60 }
 0xb14   : > { %v1836_v39 = vpop.permute.xlu0 %1835 }
 0xb15   : > { %v1828_v2 = vpop.permute.xlu1 %1827 }
 0xb16   : > { %v1856_v42 = vsel %vm1776_vm4, %v1855_v40, %v1828_v2 }
 0xb17   : > { %v1857_v16 = vsel %vm715_vm9, %v1856_v42, %v1832_v29 }
 0xb18   : > { %v1858_v45 = vsel %vm1779_vm13, %v1857_v16, %v1836_v39 }
 0xb19   : > { %v1859_v50 = vsel %vm1781_vm8, %v1858_v45, %v1840_v36 }
 0xb1c   : > { %v1760_v51 = vpop.permute.xlu0 %1759 }
 0xb1d   : > { %v1844_v32 = vpop.permute.xlu1 %1843  ;;  %v1784_v56 = vsel %vm1783_vm10, %v1782_v54, %v1760_v51 }
 0xb1e   : > { %v1860_v53 = vsel %vm1783_vm10, %v1859_v50, %v1844_v32 }
 0xb1f   : > { %v1863_v55 = vrot.slane %v1860_v53, 7 }
 0xb21   : > { %v1864_v57 = vsel %vm659_vm1, %v1784_v56, %v1863_v55 }
 0xb22   : > { %1870 = vst.msk [vmem:[%s571_s15] sm:$0x3] %vm1868_vm2, %v1864_v57 }
 0xb23 PF: > { %p27_p3 = scmp.ge.s32.totalorder %s2788_s16, 4   ;;  %s3326_s21 = smov %s2583_s22 }
 0xb24   : > { %s3327_s22 = smov %s2587_s23  ;;  %s3328_s23 = smov %s2799_s3 }
 0xb25   : > { %s3329_s24 = smov %s2788_s16  ;;  %29 = sbr.rel (!%p27_p3) target bundleno = 13 (0xd), region = 144 }
 0xb2a   :  { %1890 = vsyncpa [#allocation3], 1 }
 0xb2b   :  { %1892 = vsyncpa [#allocation3 + $0x1], 1 }
 0xb2c   :  { %1893 = vsyncpa [#allocation5], 1 }
 0xb2d   :  { %1894 = vsyncpa [#allocation8], 1 }
 0xb2e   :  { %1895 = vsyncpa [#allocation11], 1 }
 0xb2f   :  { %1896 = vsyncpa [#allocation14], 1 }
 0xb30   :  { %1897 = vsyncpa [#allocation17], 1 }

</bundles_post_ra>
